<compile_context>
chip_gen: v5e
topology: v5e:2x2
jax: 0.10.0
libtpu: 0.0.40
codegen_flags: <defaults>
</compile_context>

<pallas_src>
import math

import jax
import jax.numpy as jnp
from jax.experimental import pallas as pl
from jax.experimental.pallas import tpu as pltpu

NEG_INF = -1e30  # stand-in for float('-inf') in masked_fill (avoids NaN rows)


def sinusoidal_pe(max_len: int, size: int) -> jnp.ndarray:
    """joeynmt PositionalEncoding table, shape (max_len, size)."""
    position = jnp.arange(max_len, dtype=jnp.float32)[:, None]
    div_term = jnp.exp(
        jnp.arange(0, size, 2, dtype=jnp.float32) * -(math.log(10000.0) / size)
    )
    pe = jnp.zeros((max_len, size), dtype=jnp.float32)
    pe = pe.at[:, 0::2].set(jnp.sin(position * div_term))
    pe = pe.at[:, 1::2].set(jnp.cos(position * div_term))
    return pe


def _layer_norm(x, gamma, beta, eps=1e-6):
    mean = jnp.mean(x, axis=-1, keepdims=True)
    var = jnp.mean((x - mean) ** 2, axis=-1, keepdims=True)
    return (x - mean) * jax.lax.rsqrt(var + eps) * gamma + beta


def make_encoder_kernel(num_heads: int):
    def kernel(x_ref, mask_ref, pe_ref,
               ln1_g_ref, ln1_b_ref,
               wq_ref, bq_ref, wk_ref, bk_ref, wv_ref, bv_ref, wo_ref, bo_ref,
               ln2_g_ref, ln2_b_ref,
               w1_ref, b1_ref, w2_ref, b2_ref,
               lnf_g_ref, lnf_b_ref,
               out_ref, x_scr):
        layer = pl.program_id(1)
        num_layers = pl.num_programs(1)

        Bb, T, D = x_ref.shape          # batch-block of sequences
        H = num_heads
        dh = D // H
        N = Bb * T
        scale = 1.0 / math.sqrt(dh)

        # ---- layer 0: positional encoding add (emb_dropout = identity) ----
        @pl.when(layer == 0)
        def _init():
            x_scr[...] = x_ref[...].astype(jnp.float32) + pe_ref[...]

        mask = mask_ref[...]                              # (Bb, 1, T)
        key_bias = jnp.where(mask > 0.5, 0.0, NEG_INF)    # additive bias on keys

        x = x_scr[...]                                    # (Bb, T, D) f32 residual
        xf = x.reshape(N, D)

        # ------------- multi-head self-attention (pre-LayerNorm) -------------
        xn = _layer_norm(xf, ln1_g_ref[0], ln1_b_ref[0]).astype(jnp.bfloat16)
        q = jnp.dot(xn, wq_ref[0], preferred_element_type=jnp.float32) + bq_ref[0]
        k = jnp.dot(xn, wk_ref[0], preferred_element_type=jnp.float32) + bk_ref[0]
        v = jnp.dot(xn, wv_ref[0], preferred_element_type=jnp.float32) + bv_ref[0]
        q = (q * scale).reshape(Bb, T, D)
        k = k.reshape(Bb, T, D)
        v = v.reshape(Bb, T, D)

        # Per-head attention (softmax in f32), full context concat along lanes.
        ctx_heads = []
        for h in range(H):
            sl = slice(h * dh, (h + 1) * dh)
            q_h = q[:, :, sl].astype(jnp.bfloat16)
            k_h = k[:, :, sl].astype(jnp.bfloat16)
            v_h = v[:, :, sl].astype(jnp.bfloat16)
            scores = jnp.einsum('btd,bsd->bts', q_h, k_h,
                                preferred_element_type=jnp.float32)
            scores = scores + key_bias                    # broadcast over queries
            m = jnp.max(scores, axis=-1, keepdims=True)
            e = jnp.exp(scores - m)
            denom = jnp.sum(e, axis=-1, keepdims=True)
            attn = e * pl.reciprocal(denom, approx=True)  # softmax(dim=-1)
            ctx_h = jnp.einsum('bts,bsd->btd', attn.astype(jnp.bfloat16), v_h,
                               preferred_element_type=jnp.float32)
            ctx_heads.append(ctx_h)
        ctx = jnp.concatenate(ctx_heads, axis=-1).reshape(N, D)

        # Single K=D output projection (full MXU contraction depth).
        att = jnp.dot(ctx.astype(jnp.bfloat16), wo_ref[0],
                      preferred_element_type=jnp.float32) + bo_ref[0]
        xf = xf + att                    # dropout = identity at inference

        # ------------- position-wise feed-forward (pre-LayerNorm) -------------
        xn2 = _layer_norm(xf, ln2_g_ref[0], ln2_b_ref[0]).astype(jnp.bfloat16)
        hdn = jnp.dot(xn2, w1_ref[0], preferred_element_type=jnp.float32) + b1_ref[0]
        hdn = jnp.maximum(hdn, 0.0)      # ReLU
        ff = jnp.dot(hdn.astype(jnp.bfloat16), w2_ref[0],
                     preferred_element_type=jnp.float32) + b2_ref[0]
        xf = xf + ff

        x_scr[...] = xf.reshape(Bb, T, D)

        # ---- last layer: final encoder LayerNorm into the output block ----
        @pl.when(layer == num_layers - 1)
        def _finalize():
            y = _layer_norm(x_scr[...].reshape(N, D), lnf_g_ref[...], lnf_b_ref[...])
            out_ref[...] = y.reshape(Bb, T, D).astype(out_ref.dtype)

    return kernel


def transformer_encoder_forward(embed_src, src_length, mask, params,
                                num_layers, num_heads,
                                block_b=None, vmem_limit_bytes=None):
    """Equivalent of TransformerEncoder.forward; returns (output, None).
    src_length is accepted but unused (same as the PyTorch forward)."""
    del src_length
    B, T, D = embed_src.shape
    mask = mask.astype(jnp.float32)                 # contract: 1.0 valid / 0.0 pad
    pe_sliced = params['pe'][:T]                    # (T, D): only rows actually used

    if block_b is None:
        # Aim for >= 256 rows per projection/FFN matmul (MXU depth on v6e/v7x),
        # subject to dividing the batch.
        target = max(1, 256 // max(T, 1))
        block_b = 1
        for cand in range(min(B, target), 0, -1):
            if B % cand == 0:
                block_b = cand
                break
    assert B % block_b == 0

    kernel = make_encoder_kernel(num_heads)

    def batch_spec(block_shape):
        # Per-batch-block, layer-invariant (stays VMEM-resident across the layer axis).
        return pl.BlockSpec(block_shape,
                            lambda b, l: (b,) + (0,) * (len(block_shape) - 1))

    def layer_spec(full_shape):
        # One layer's slice of a stacked parameter, streamed along the layer axis
        # (auto double-buffered by the Pallas pipeline).
        block = (1,) + tuple(full_shape[1:])
        return pl.BlockSpec(block, lambda b, l: (l,) + (0,) * (len(full_shape) - 1))

    def shared_spec(full_shape):
        return pl.BlockSpec(tuple(full_shape), lambda b, l: (0,) * len(full_shape))

    in_specs = [
        batch_spec((block_b, T, D)),                 # embed_src
        batch_spec((block_b, 1, T)),                 # mask
        shared_spec(pe_sliced.shape),                # positional encoding (T, D)
    ]
    args = [embed_src, mask, pe_sliced]

    per_layer = ['ln1_g', 'ln1_b', 'wq', 'bq', 'wk', 'bk', 'wv', 'bv',
                 'wo', 'bo', 'ln2_g', 'ln2_b', 'w1', 'b1', 'w2', 'b2']
    for name in per_layer:
        w = params[name]
        in_specs.append(layer_spec(w.shape))
        args.append(w)
    for name in ['lnf_g', 'lnf_b']:
        w = params[name]
        in_specs.append(shared_spec(w.shape))
        args.append(w)

    cp_kwargs = dict(dimension_semantics=("parallel", "arbitrary"))
    if vmem_limit_bytes is not None:
        cp_kwargs["vmem_limit_bytes"] = vmem_limit_bytes

    out = pl.pallas_call(
        kernel,
        out_shape=jax.ShapeDtypeStruct((B, T, D), jnp.float32),
        grid_spec=pltpu.PrefetchScalarGridSpec(
            num_scalar_prefetch=0,
            grid=(B // block_b, num_layers),          # layer (carried) axis last
            in_specs=in_specs,
            out_specs=pl.BlockSpec((block_b, T, D), lambda b, l: (b, 0, 0)),
            scratch_shapes=[pltpu.VMEM((block_b, T, D), jnp.float32)],  # residual x
        ),
        compiler_params=pltpu.CompilerParams(**cp_kwargs),
    )(*args)
    return out, None


def init_params(key, num_layers, hidden, ff_size, max_len):
    """Deterministic synthetic parameters (stacked over layers).
    Weight matrices are bf16 (MXU-native); biases / LayerNorm params are f32."""
    L, D, FF = num_layers, hidden, ff_size

    def w(k, shape, scale=0.02):
        return (jax.random.normal(k, shape, dtype=jnp.float32) * scale).astype(jnp.bfloat16)

    def b(k, shape, scale=0.02):
        return jax.random.normal(k, shape, dtype=jnp.float32) * scale

    ks = iter(jax.random.split(key, 16))
    return {
        'pe': sinusoidal_pe(max_len, D),
        'ln1_g': jnp.ones((L, 1, D), jnp.float32), 'ln1_b': jnp.zeros((L, 1, D), jnp.float32),
        'wq': w(next(ks), (L, D, D)), 'bq': b(next(ks), (L, 1, D)),
        'wk': w(next(ks), (L, D, D)), 'bk': b(next(ks), (L, 1, D)),
        'wv': w(next(ks), (L, D, D)), 'bv': b(next(ks), (L, 1, D)),
        'wo': w(next(ks), (L, D, D)), 'bo': b(next(ks), (L, 1, D)),
        'ln2_g': jnp.ones((L, 1, D), jnp.float32), 'ln2_b': jnp.zeros((L, 1, D), jnp.float32),
        'w1': w(next(ks), (L, D, FF)), 'b1': b(next(ks), (L, 1, FF)),
        'w2': w(next(ks), (L, FF, D)), 'b2': b(next(ks), (L, 1, D)),
        'lnf_g': jnp.ones((1, D), jnp.float32), 'lnf_b': jnp.zeros((1, D), jnp.float32),
    }


def reference_forward(embed_src, mask, params, num_layers, num_heads):
    """Pure-JAX reference (f32 activations against the same bf16 weights)."""
    B, T, D = embed_src.shape
    H = num_heads
    dh = D // H
    x = embed_src + params['pe'][:T][None]
    key_bias = jnp.where(mask.astype(jnp.float32) > 0.5, 0.0, NEG_INF)  # (B,1,T)
    for l in range(num_layers):
        xn = _layer_norm(x, params['ln1_g'][l], params['ln1_b'][l])
        q = jnp.einsum('btd,de->bte', xn, params['wq'][l].astype(jnp.float32)) + params['bq'][l]
        k = jnp.einsum('btd,de->bte', xn, params['wk'][l].astype(jnp.float32)) + params['bk'][l]
        v = jnp.einsum('btd,de->bte', xn, params['wv'][l].astype(jnp.float32)) + params['bv'][l]
        q = (q / math.sqrt(dh)).reshape(B, T, H, dh)
        k = k.reshape(B, T, H, dh)
        v = v.reshape(B, T, H, dh)
        scores = jnp.einsum('bthd,bshd->bhts', q, k) + key_bias[:, :, None, :]
        attn = jax.nn.softmax(scores, axis=-1)
        ctx = jnp.einsum('bhts,bshd->bthd', attn, v).reshape(B, T, D)
        att = jnp.einsum('btd,de->bte', ctx, params['wo'][l].astype(jnp.float32)) + params['bo'][l]
        x = x + att
        xn2 = _layer_norm(x, params['ln2_g'][l], params['ln2_b'][l])
        h1 = jnp.maximum(
            jnp.einsum('btd,df->btf', xn2, params['w1'][l].astype(jnp.float32)) + params['b1'][l],
            0.0)
        ff = jnp.einsum('btf,fd->btd', h1, params['w2'][l].astype(jnp.float32)) + params['b2'][l]
        x = x + ff
    return _layer_norm(x, params['lnf_g'], params['lnf_b'])


if __name__ == "__main__":
    # Small but TPU-friendly configuration: D multiple of 128 (lane-dense),
    # T multiple of 8 (sublane), max_len > T to exercise the PE slicing fix.
    B, T, D, FF, H, L = 2, 8, 128, 256, 4, 2
    MAX_LEN = 32

    key = jax.random.PRNGKey(0)
    k_x, k_p = jax.random.split(key)

    embed_src = jax.random.normal(k_x, (B, T, D), dtype=jnp.float32)
    src_length = jnp.array([T, 5], dtype=jnp.int32)
    mask = (jnp.arange(T)[None, :] < src_length[:, None]).astype(jnp.float32)[:, None, :]

    params = init_params(k_p, L, D, FF, MAX_LEN)

    out, hidden_concat = transformer_encoder_forward(
        embed_src, src_length, mask, params, num_layers=L, num_heads=H)
    out = jax.block_until_ready(out)

    assert out.shape == (B, T, D)
    assert hidden_concat is None
    assert bool(jnp.all(jnp.isfinite(out)))

    ref = reference_forward(embed_src, mask, params, L, H)
    max_err = float(jnp.max(jnp.abs(out - ref)))
    assert max_err < 5e-2, f"max abs error vs reference: {max_err}"

    print("KERNEL_OK")
</pallas_src>

<mosaic_0001>
module attributes {stable_mosaic.version = 11 : i64} {
  func.func @kernel(%arg0: i32, %arg1: i32, %arg2: memref<2x8x128xf32, #tpu.memory_space<vmem>>, %arg3: memref<2x1x8xf32, #tpu.memory_space<vmem>>, %arg4: memref<8x128xf32, #tpu.memory_space<vmem>>, %arg5: memref<1x1x128xf32, #tpu.memory_space<vmem>>, %arg6: memref<1x1x128xf32, #tpu.memory_space<vmem>>, %arg7: memref<1x128x128xbf16, #tpu.memory_space<vmem>>, %arg8: memref<1x1x128xf32, #tpu.memory_space<vmem>>, %arg9: memref<1x128x128xbf16, #tpu.memory_space<vmem>>, %arg10: memref<1x1x128xf32, #tpu.memory_space<vmem>>, %arg11: memref<1x128x128xbf16, #tpu.memory_space<vmem>>, %arg12: memref<1x1x128xf32, #tpu.memory_space<vmem>>, %arg13: memref<1x128x128xbf16, #tpu.memory_space<vmem>>, %arg14: memref<1x1x128xf32, #tpu.memory_space<vmem>>, %arg15: memref<1x1x128xf32, #tpu.memory_space<vmem>>, %arg16: memref<1x1x128xf32, #tpu.memory_space<vmem>>, %arg17: memref<1x128x256xbf16, #tpu.memory_space<vmem>>, %arg18: memref<1x1x256xf32, #tpu.memory_space<vmem>>, %arg19: memref<1x256x128xbf16, #tpu.memory_space<vmem>>, %arg20: memref<1x1x128xf32, #tpu.memory_space<vmem>>, %arg21: memref<1x128xf32, #tpu.memory_space<vmem>>, %arg22: memref<1x128xf32, #tpu.memory_space<vmem>>, %arg23: memref<2x8x128xf32, #tpu.memory_space<vmem>>, %arg24: memref<2x8x128xf32, #tpu.memory_space<vmem>>) attributes {dimension_semantics = [#tpu.dimension_semantics<parallel>, #tpu.dimension_semantics<arbitrary>], iteration_bounds = array<i64: 1, 2>, scalar_prefetch = 0 : i64, scratch_operands = 1 : i64, tpu.core_type = #tpu.core_type<tc>, window_params = [{transform_indices = @transform_0, window_bounds = array<i64: 2, 8, 128>}, {transform_indices = @transform_1, window_bounds = array<i64: 2, 1, 8>}, {pipeline_mode = #tpu.pipeline_mode<synchronous>, transform_indices = @transform_2, window_bounds = array<i64: 8, 128>}, {transform_indices = @transform_3, window_bounds = array<i64: 1, 1, 128>}, {transform_indices = @transform_4, window_bounds = array<i64: 1, 1, 128>}, {transform_indices = @transform_5, window_bounds = array<i64: 1, 128, 128>}, {transform_indices = @transform_6, window_bounds = array<i64: 1, 1, 128>}, {transform_indices = @transform_7, window_bounds = array<i64: 1, 128, 128>}, {transform_indices = @transform_8, window_bounds = array<i64: 1, 1, 128>}, {transform_indices = @transform_9, window_bounds = array<i64: 1, 128, 128>}, {transform_indices = @transform_10, window_bounds = array<i64: 1, 1, 128>}, {transform_indices = @transform_11, window_bounds = array<i64: 1, 128, 128>}, {transform_indices = @transform_12, window_bounds = array<i64: 1, 1, 128>}, {transform_indices = @transform_13, window_bounds = array<i64: 1, 1, 128>}, {transform_indices = @transform_14, window_bounds = array<i64: 1, 1, 128>}, {transform_indices = @transform_15, window_bounds = array<i64: 1, 128, 256>}, {transform_indices = @transform_16, window_bounds = array<i64: 1, 1, 256>}, {transform_indices = @transform_17, window_bounds = array<i64: 1, 256, 128>}, {transform_indices = @transform_18, window_bounds = array<i64: 1, 1, 128>}, {pipeline_mode = #tpu.pipeline_mode<synchronous>, transform_indices = @transform_19, window_bounds = array<i64: 1, 128>}, {pipeline_mode = #tpu.pipeline_mode<synchronous>, transform_indices = @transform_20, window_bounds = array<i64: 1, 128>}, {transform_indices = @transform_21, window_bounds = array<i64: 2, 8, 128>}]} {
    %c0_i32 = arith.constant 0 : i32
    %0 = arith.cmpi eq, %arg1, %c0_i32 : i32
    %1 = arith.extui %0 : i1 to i32
    %c0_i32_0 = arith.constant 0 : i32
    %2 = arith.cmpi ne, %1, %c0_i32_0 : i32
    scf.if %2 {
      %c0_94 = arith.constant 0 : index
      %c0_95 = arith.constant 0 : index
      %c0_96 = arith.constant 0 : index
      %209 = vector.load %arg2[%c0_94, %c0_95, %c0_96] : memref<2x8x128xf32, #tpu.memory_space<vmem>>, vector<2x8x128xf32>
      %c0_97 = arith.constant 0 : index
      %c0_98 = arith.constant 0 : index
      %210 = vector.load %arg4[%c0_97, %c0_98] : memref<8x128xf32, #tpu.memory_space<vmem>>, vector<8x128xf32>
      %211 = vector.shape_cast %210 : vector<8x128xf32> to vector<1x8x128xf32>
      %212 = vector.broadcast %211 : vector<1x8x128xf32> to vector<2x8x128xf32>
      %213 = arith.addf %209, %212 : vector<2x8x128xf32>
      %c0_99 = arith.constant 0 : index
      %c0_100 = arith.constant 0 : index
      %c0_101 = arith.constant 0 : index
      %214 = vector.load %arg24[%c0_99, %c0_100, %c0_101] : memref<2x8x128xf32, #tpu.memory_space<vmem>>, vector<2x8x128xf32>
      tpu.vector_store %arg24[%c0_99, %c0_100, %c0_101], %213 {strides = array<i32>} : memref<2x8x128xf32, #tpu.memory_space<vmem>>, vector<2x8x128xf32>,
    } else {
    }
    %c0 = arith.constant 0 : index
    %c0_1 = arith.constant 0 : index
    %c0_2 = arith.constant 0 : index
    %3 = vector.load %arg3[%c0, %c0_1, %c0_2] : memref<2x1x8xf32, #tpu.memory_space<vmem>>, vector<2x1x8xf32>
    %cst = arith.constant 5.000000e-01 : f32
    %4 = vector.broadcast %cst : f32 to vector<2x1x8xf32>
    %5 = arith.cmpf ogt, %3, %4 : vector<2x1x8xf32>
    %cst_3 = arith.constant 0.000000e+00 : f32
    %cst_4 = arith.constant -1.000000e+30 : f32
    %6 = vector.broadcast %cst_3 : f32 to vector<2x1x8xf32>
    %7 = vector.broadcast %cst_4 : f32 to vector<2x1x8xf32>
    %8 = arith.select %5, %6, %7 : vector<2x1x8xi1>, vector<2x1x8xf32>
    %c0_5 = arith.constant 0 : index
    %c0_6 = arith.constant 0 : index
    %c0_7 = arith.constant 0 : index
    %9 = vector.load %arg24[%c0_5, %c0_6, %c0_7] : memref<2x8x128xf32, #tpu.memory_space<vmem>>, vector<2x8x128xf32>
    %10 = vector.shape_cast %9 : vector<2x8x128xf32> to vector<16x128xf32>
    %c0_8 = arith.constant 0 : index
    %c0_9 = arith.constant 0 : index
    %c0_10 = arith.constant 0 : index
    %11 = vector.load %arg5[%c0_8, %c0_9, %c0_10] : memref<1x1x128xf32, #tpu.memory_space<vmem>>, vector<1x1x128xf32>
    %12 = vector.shape_cast %11 : vector<1x1x128xf32> to vector<1x128xf32>
    %c0_11 = arith.constant 0 : index
    %c0_12 = arith.constant 0 : index
    %c0_13 = arith.constant 0 : index
    %13 = vector.load %arg6[%c0_11, %c0_12, %c0_13] : memref<1x1x128xf32, #tpu.memory_space<vmem>>, vector<1x1x128xf32>
    %14 = vector.shape_cast %13 : vector<1x1x128xf32> to vector<1x128xf32>
    %cst_14 = arith.constant dense<0.000000e+00> : vector<16xf32>
    %15 = vector.multi_reduction <add>, %10, %cst_14 [1] : vector<16x128xf32> to vector<16xf32>
    %16 = vector.shape_cast %15 : vector<16xf32> to vector<16x1xf32>
    %cst_15 = arith.constant 1.280000e+02 : f32
    %17 = vector.broadcast %cst_15 : f32 to vector<16x1xf32>
    %18 = arith.divf %16, %17 : vector<16x1xf32>
    %19 = vector.broadcast %18 : vector<16x1xf32> to vector<16x128xf32>
    %20 = arith.subf %10, %19 : vector<16x128xf32>
    %21 = arith.mulf %20, %20 : vector<16x128xf32>
    %cst_16 = arith.constant dense<0.000000e+00> : vector<16xf32>
    %22 = vector.multi_reduction <add>, %21, %cst_16 [1] : vector<16x128xf32> to vector<16xf32>
    %23 = vector.shape_cast %22 : vector<16xf32> to vector<16x1xf32>
    %cst_17 = arith.constant 1.280000e+02 : f32
    %24 = vector.broadcast %cst_17 : f32 to vector<16x1xf32>
    %25 = arith.divf %23, %24 : vector<16x1xf32>
    %26 = vector.broadcast %18 : vector<16x1xf32> to vector<16x128xf32>
    %27 = arith.subf %10, %26 : vector<16x128xf32>
    %cst_18 = arith.constant 9.99999997E-7 : f32
    %28 = vector.broadcast %cst_18 : f32 to vector<16x1xf32>
    %29 = arith.addf %25, %28 : vector<16x1xf32>
    %30 = math.rsqrt %29 : vector<16x1xf32>
    %31 = vector.broadcast %30 : vector<16x1xf32> to vector<16x128xf32>
    %32 = arith.mulf %27, %31 : vector<16x128xf32>
    %33 = vector.broadcast %12 : vector<1x128xf32> to vector<16x128xf32>
    %34 = arith.mulf %32, %33 : vector<16x128xf32>
    %35 = vector.broadcast %14 : vector<1x128xf32> to vector<16x128xf32>
    %36 = arith.addf %34, %35 : vector<16x128xf32>
    %37 = arith.truncf %36 : vector<16x128xf32> to vector<16x128xbf16>
    %c0_19 = arith.constant 0 : index
    %c0_20 = arith.constant 0 : index
    %c0_21 = arith.constant 0 : index
    %38 = vector.load %arg7[%c0_19, %c0_20, %c0_21] : memref<1x128x128xbf16, #tpu.memory_space<vmem>>, vector<1x128x128xbf16>
    %39 = vector.shape_cast %38 : vector<1x128x128xbf16> to vector<128x128xbf16>
    %cst_22 = arith.constant dense<0.000000e+00> : vector<16x128xf32>
    %40 = tpu.matmul %37, %39, %cst_22 {dimension_numbers = #tpu.dot_dimension_numbers<[1], [0], [0], [1], [0, 0, 1, 1], [], []>} : vector<16x128xbf16>, vector<128x128xbf16>, vector<16x128xf32> -> vector<16x128xf32>
    %c0_23 = arith.constant 0 : index
    %c0_24 = arith.constant 0 : index
    %c0_25 = arith.constant 0 : index
    %41 = vector.load %arg8[%c0_23, %c0_24, %c0_25] : memref<1x1x128xf32, #tpu.memory_space<vmem>>, vector<1x1x128xf32>
    %42 = vector.shape_cast %41 : vector<1x1x128xf32> to vector<1x128xf32>
    %43 = vector.broadcast %42 : vector<1x128xf32> to vector<16x128xf32>
    %44 = arith.addf %40, %43 : vector<16x128xf32>
    %c0_26 = arith.constant 0 : index
    %c0_27 = arith.constant 0 : index
    %c0_28 = arith.constant 0 : index
    %45 = vector.load %arg9[%c0_26, %c0_27, %c0_28] : memref<1x128x128xbf16, #tpu.memory_space<vmem>>, vector<1x128x128xbf16>
    %46 = vector.shape_cast %45 : vector<1x128x128xbf16> to vector<128x128xbf16>
    %cst_29 = arith.constant dense<0.000000e+00> : vector<16x128xf32>
    %47 = tpu.matmul %37, %46, %cst_29 {dimension_numbers = #tpu.dot_dimension_numbers<[1], [0], [0], [1], [0, 0, 1, 1], [], []>} : vector<16x128xbf16>, vector<128x128xbf16>, vector<16x128xf32> -> vector<16x128xf32>
    %c0_30 = arith.constant 0 : index
    %c0_31 = arith.constant 0 : index
    %c0_32 = arith.constant 0 : index
    %48 = vector.load %arg10[%c0_30, %c0_31, %c0_32] : memref<1x1x128xf32, #tpu.memory_space<vmem>>, vector<1x1x128xf32>
    %49 = vector.shape_cast %48 : vector<1x1x128xf32> to vector<1x128xf32>
    %50 = vector.broadcast %49 : vector<1x128xf32> to vector<16x128xf32>
    %51 = arith.addf %47, %50 : vector<16x128xf32>
    %c0_33 = arith.constant 0 : index
    %c0_34 = arith.constant 0 : index
    %c0_35 = arith.constant 0 : index
    %52 = vector.load %arg11[%c0_33, %c0_34, %c0_35] : memref<1x128x128xbf16, #tpu.memory_space<vmem>>, vector<1x128x128xbf16>
    %53 = vector.shape_cast %52 : vector<1x128x128xbf16> to vector<128x128xbf16>
    %cst_36 = arith.constant dense<0.000000e+00> : vector<16x128xf32>
    %54 = tpu.matmul %37, %53, %cst_36 {dimension_numbers = #tpu.dot_dimension_numbers<[1], [0], [0], [1], [0, 0, 1, 1], [], []>} : vector<16x128xbf16>, vector<128x128xbf16>, vector<16x128xf32> -> vector<16x128xf32>
    %c0_37 = arith.constant 0 : index
    %c0_38 = arith.constant 0 : index
    %c0_39 = arith.constant 0 : index
    %55 = vector.load %arg12[%c0_37, %c0_38, %c0_39] : memref<1x1x128xf32, #tpu.memory_space<vmem>>, vector<1x1x128xf32>
    %56 = vector.shape_cast %55 : vector<1x1x128xf32> to vector<1x128xf32>
    %57 = vector.broadcast %56 : vector<1x128xf32> to vector<16x128xf32>
    %58 = arith.addf %54, %57 : vector<16x128xf32>
    %cst_40 = arith.constant 0.176776692 : f32
    %59 = vector.broadcast %cst_40 : f32 to vector<16x128xf32>
    %60 = arith.mulf %44, %59 : vector<16x128xf32>
    %61 = vector.shape_cast %60 : vector<16x128xf32> to vector<2x8x128xf32>
    %62 = vector.shape_cast %51 : vector<16x128xf32> to vector<2x8x128xf32>
    %63 = vector.shape_cast %58 : vector<16x128xf32> to vector<2x8x128xf32>
    %64 = vector.extract_strided_slice %61 {offsets = [0, 0, 0], sizes = [2, 8, 32], strides = [1, 1, 1]} : vector<2x8x128xf32> to vector<2x8x32xf32>
    %65 = arith.truncf %64 : vector<2x8x32xf32> to vector<2x8x32xbf16>
    %66 = vector.extract_strided_slice %62 {offsets = [0, 0, 0], sizes = [2, 8, 32], strides = [1, 1, 1]} : vector<2x8x128xf32> to vector<2x8x32xf32>
    %67 = arith.truncf %66 : vector<2x8x32xf32> to vector<2x8x32xbf16>
    %68 = vector.extract_strided_slice %63 {offsets = [0, 0, 0], sizes = [2, 8, 32], strides = [1, 1, 1]} : vector<2x8x128xf32> to vector<2x8x32xf32>
    %69 = arith.truncf %68 : vector<2x8x32xf32> to vector<2x8x32xbf16>
    "tpu.trace_start"() <{level = 10 : i32, message = "btd,bsd->bts"}> : () -> ()
    %cst_41 = arith.constant dense<0.000000e+00> : vector<2x8x8xf32>
    %70 = tpu.matmul %65, %67, %cst_41 {dimension_numbers = #tpu.dot_dimension_numbers<[2], [2], [1], [1], [0, 0, 0, 1, 1, 1], [0], [0]>} : vector<2x8x32xbf16>, vector<2x8x32xbf16>, vector<2x8x8xf32> -> vector<2x8x8xf32>
    "tpu.trace_stop"() : () -> ()
    %71 = vector.broadcast %8 : vector<2x1x8xf32> to vector<2x8x8xf32>
    %72 = arith.addf %70, %71 : vector<2x8x8xf32>
    %cst_42 = arith.constant dense<0xFF800000> : vector<2x8xf32>
    %73 = vector.multi_reduction <maximumf>, %72, %cst_42 [2] : vector<2x8x8xf32> to vector<2x8xf32>
    %74 = vector.shape_cast %73 : vector<2x8xf32> to vector<2x8x1xf32>
    %75 = vector.broadcast %74 : vector<2x8x1xf32> to vector<2x8x8xf32>
    %76 = arith.subf %72, %75 : vector<2x8x8xf32>
    %77 = math.exp %76 : vector<2x8x8xf32>
    %cst_43 = arith.constant dense<0.000000e+00> : vector<2x8xf32>
    %78 = vector.multi_reduction <add>, %77, %cst_43 [2] : vector<2x8x8xf32> to vector<2x8xf32>
    %79 = vector.shape_cast %78 : vector<2x8xf32> to vector<2x8x1xf32>
    %80 = tpu.reciprocal %79 {approx = true} : vector<2x8x1xf32> -> vector<2x8x1xf32>
    %81 = vector.broadcast %80 : vector<2x8x1xf32> to vector<2x8x8xf32>
    %82 = arith.mulf %77, %81 : vector<2x8x8xf32>
    %83 = arith.truncf %82 : vector<2x8x8xf32> to vector<2x8x8xbf16>
    "tpu.trace_start"() <{level = 10 : i32, message = "bts,bsd->btd"}> : () -> ()
    %cst_44 = arith.constant dense<0.000000e+00> : vector<2x8x32xf32>
    %84 = tpu.matmul %83, %69, %cst_44 {dimension_numbers = #tpu.dot_dimension_numbers<[2], [1], [1], [2], [0, 0, 0, 1, 1, 2], [0], [0]>} : vector<2x8x8xbf16>, vector<2x8x32xbf16>, vector<2x8x32xf32> -> vector<2x8x32xf32>
    "tpu.trace_stop"() : () -> ()
    %85 = vector.extract_strided_slice %61 {offsets = [0, 0, 32], sizes = [2, 8, 32], strides = [1, 1, 1]} : vector<2x8x128xf32> to vector<2x8x32xf32>
    %86 = arith.truncf %85 : vector<2x8x32xf32> to vector<2x8x32xbf16>
    %87 = vector.extract_strided_slice %62 {offsets = [0, 0, 32], sizes = [2, 8, 32], strides = [1, 1, 1]} : vector<2x8x128xf32> to vector<2x8x32xf32>
    %88 = arith.truncf %87 : vector<2x8x32xf32> to vector<2x8x32xbf16>
    %89 = vector.extract_strided_slice %63 {offsets = [0, 0, 32], sizes = [2, 8, 32], strides = [1, 1, 1]} : vector<2x8x128xf32> to vector<2x8x32xf32>
    %90 = arith.truncf %89 : vector<2x8x32xf32> to vector<2x8x32xbf16>
    "tpu.trace_start"() <{level = 10 : i32, message = "btd,bsd->bts"}> : () -> ()
    %cst_45 = arith.constant dense<0.000000e+00> : vector<2x8x8xf32>
    %91 = tpu.matmul %86, %88, %cst_45 {dimension_numbers = #tpu.dot_dimension_numbers<[2], [2], [1], [1], [0, 0, 0, 1, 1, 1], [0], [0]>} : vector<2x8x32xbf16>, vector<2x8x32xbf16>, vector<2x8x8xf32> -> vector<2x8x8xf32>
    "tpu.trace_stop"() : () -> ()
    %92 = vector.broadcast %8 : vector<2x1x8xf32> to vector<2x8x8xf32>
    %93 = arith.addf %91, %92 : vector<2x8x8xf32>
    %cst_46 = arith.constant dense<0xFF800000> : vector<2x8xf32>
    %94 = vector.multi_reduction <maximumf>, %93, %cst_46 [2] : vector<2x8x8xf32> to vector<2x8xf32>
    %95 = vector.shape_cast %94 : vector<2x8xf32> to vector<2x8x1xf32>
    %96 = vector.broadcast %95 : vector<2x8x1xf32> to vector<2x8x8xf32>
    %97 = arith.subf %93, %96 : vector<2x8x8xf32>
    %98 = math.exp %97 : vector<2x8x8xf32>
    %cst_47 = arith.constant dense<0.000000e+00> : vector<2x8xf32>
    %99 = vector.multi_reduction <add>, %98, %cst_47 [2] : vector<2x8x8xf32> to vector<2x8xf32>
    %100 = vector.shape_cast %99 : vector<2x8xf32> to vector<2x8x1xf32>
    %101 = tpu.reciprocal %100 {approx = true} : vector<2x8x1xf32> -> vector<2x8x1xf32>
    %102 = vector.broadcast %101 : vector<2x8x1xf32> to vector<2x8x8xf32>
    %103 = arith.mulf %98, %102 : vector<2x8x8xf32>
    %104 = arith.truncf %103 : vector<2x8x8xf32> to vector<2x8x8xbf16>
    "tpu.trace_start"() <{level = 10 : i32, message = "bts,bsd->btd"}> : () -> ()
    %cst_48 = arith.constant dense<0.000000e+00> : vector<2x8x32xf32>
    %105 = tpu.matmul %104, %90, %cst_48 {dimension_numbers = #tpu.dot_dimension_numbers<[2], [1], [1], [2], [0, 0, 0, 1, 1, 2], [0], [0]>} : vector<2x8x8xbf16>, vector<2x8x32xbf16>, vector<2x8x32xf32> -> vector<2x8x32xf32>
    "tpu.trace_stop"() : () -> ()
    %106 = vector.extract_strided_slice %61 {offsets = [0, 0, 64], sizes = [2, 8, 32], strides = [1, 1, 1]} : vector<2x8x128xf32> to vector<2x8x32xf32>
    %107 = arith.truncf %106 : vector<2x8x32xf32> to vector<2x8x32xbf16>
    %108 = vector.extract_strided_slice %62 {offsets = [0, 0, 64], sizes = [2, 8, 32], strides = [1, 1, 1]} : vector<2x8x128xf32> to vector<2x8x32xf32>
    %109 = arith.truncf %108 : vector<2x8x32xf32> to vector<2x8x32xbf16>
    %110 = vector.extract_strided_slice %63 {offsets = [0, 0, 64], sizes = [2, 8, 32], strides = [1, 1, 1]} : vector<2x8x128xf32> to vector<2x8x32xf32>
    %111 = arith.truncf %110 : vector<2x8x32xf32> to vector<2x8x32xbf16>
    "tpu.trace_start"() <{level = 10 : i32, message = "btd,bsd->bts"}> : () -> ()
    %cst_49 = arith.constant dense<0.000000e+00> : vector<2x8x8xf32>
    %112 = tpu.matmul %107, %109, %cst_49 {dimension_numbers = #tpu.dot_dimension_numbers<[2], [2], [1], [1], [0, 0, 0, 1, 1, 1], [0], [0]>} : vector<2x8x32xbf16>, vector<2x8x32xbf16>, vector<2x8x8xf32> -> vector<2x8x8xf32>
    "tpu.trace_stop"() : () -> ()
    %113 = vector.broadcast %8 : vector<2x1x8xf32> to vector<2x8x8xf32>
    %114 = arith.addf %112, %113 : vector<2x8x8xf32>
    %cst_50 = arith.constant dense<0xFF800000> : vector<2x8xf32>
    %115 = vector.multi_reduction <maximumf>, %114, %cst_50 [2] : vector<2x8x8xf32> to vector<2x8xf32>
    %116 = vector.shape_cast %115 : vector<2x8xf32> to vector<2x8x1xf32>
    %117 = vector.broadcast %116 : vector<2x8x1xf32> to vector<2x8x8xf32>
    %118 = arith.subf %114, %117 : vector<2x8x8xf32>
    %119 = math.exp %118 : vector<2x8x8xf32>
    %cst_51 = arith.constant dense<0.000000e+00> : vector<2x8xf32>
    %120 = vector.multi_reduction <add>, %119, %cst_51 [2] : vector<2x8x8xf32> to vector<2x8xf32>
    %121 = vector.shape_cast %120 : vector<2x8xf32> to vector<2x8x1xf32>
    %122 = tpu.reciprocal %121 {approx = true} : vector<2x8x1xf32> -> vector<2x8x1xf32>
    %123 = vector.broadcast %122 : vector<2x8x1xf32> to vector<2x8x8xf32>
    %124 = arith.mulf %119, %123 : vector<2x8x8xf32>
    %125 = arith.truncf %124 : vector<2x8x8xf32> to vector<2x8x8xbf16>
    "tpu.trace_start"() <{level = 10 : i32, message = "bts,bsd->btd"}> : () -> ()
    %cst_52 = arith.constant dense<0.000000e+00> : vector<2x8x32xf32>
    %126 = tpu.matmul %125, %111, %cst_52 {dimension_numbers = #tpu.dot_dimension_numbers<[2], [1], [1], [2], [0, 0, 0, 1, 1, 2], [0], [0]>} : vector<2x8x8xbf16>, vector<2x8x32xbf16>, vector<2x8x32xf32> -> vector<2x8x32xf32>
    "tpu.trace_stop"() : () -> ()
    %127 = vector.extract_strided_slice %61 {offsets = [0, 0, 96], sizes = [2, 8, 32], strides = [1, 1, 1]} : vector<2x8x128xf32> to vector<2x8x32xf32>
    %128 = arith.truncf %127 : vector<2x8x32xf32> to vector<2x8x32xbf16>
    %129 = vector.extract_strided_slice %62 {offsets = [0, 0, 96], sizes = [2, 8, 32], strides = [1, 1, 1]} : vector<2x8x128xf32> to vector<2x8x32xf32>
    %130 = arith.truncf %129 : vector<2x8x32xf32> to vector<2x8x32xbf16>
    %131 = vector.extract_strided_slice %63 {offsets = [0, 0, 96], sizes = [2, 8, 32], strides = [1, 1, 1]} : vector<2x8x128xf32> to vector<2x8x32xf32>
    %132 = arith.truncf %131 : vector<2x8x32xf32> to vector<2x8x32xbf16>
    "tpu.trace_start"() <{level = 10 : i32, message = "btd,bsd->bts"}> : () -> ()
    %cst_53 = arith.constant dense<0.000000e+00> : vector<2x8x8xf32>
    %133 = tpu.matmul %128, %130, %cst_53 {dimension_numbers = #tpu.dot_dimension_numbers<[2], [2], [1], [1], [0, 0, 0, 1, 1, 1], [0], [0]>} : vector<2x8x32xbf16>, vector<2x8x32xbf16>, vector<2x8x8xf32> -> vector<2x8x8xf32>
    "tpu.trace_stop"() : () -> ()
    %134 = vector.broadcast %8 : vector<2x1x8xf32> to vector<2x8x8xf32>
    %135 = arith.addf %133, %134 : vector<2x8x8xf32>
    %cst_54 = arith.constant dense<0xFF800000> : vector<2x8xf32>
    %136 = vector.multi_reduction <maximumf>, %135, %cst_54 [2] : vector<2x8x8xf32> to vector<2x8xf32>
    %137 = vector.shape_cast %136 : vector<2x8xf32> to vector<2x8x1xf32>
    %138 = vector.broadcast %137 : vector<2x8x1xf32> to vector<2x8x8xf32>
    %139 = arith.subf %135, %138 : vector<2x8x8xf32>
    %140 = math.exp %139 : vector<2x8x8xf32>
    %cst_55 = arith.constant dense<0.000000e+00> : vector<2x8xf32>
    %141 = vector.multi_reduction <add>, %140, %cst_55 [2] : vector<2x8x8xf32> to vector<2x8xf32>
    %142 = vector.shape_cast %141 : vector<2x8xf32> to vector<2x8x1xf32>
    %143 = tpu.reciprocal %142 {approx = true} : vector<2x8x1xf32> -> vector<2x8x1xf32>
    %144 = vector.broadcast %143 : vector<2x8x1xf32> to vector<2x8x8xf32>
    %145 = arith.mulf %140, %144 : vector<2x8x8xf32>
    %146 = arith.truncf %145 : vector<2x8x8xf32> to vector<2x8x8xbf16>
    "tpu.trace_start"() <{level = 10 : i32, message = "bts,bsd->btd"}> : () -> ()
    %cst_56 = arith.constant dense<0.000000e+00> : vector<2x8x32xf32>
    %147 = tpu.matmul %146, %132, %cst_56 {dimension_numbers = #tpu.dot_dimension_numbers<[2], [1], [1], [2], [0, 0, 0, 1, 1, 2], [0], [0]>} : vector<2x8x8xbf16>, vector<2x8x32xbf16>, vector<2x8x32xf32> -> vector<2x8x32xf32>
    "tpu.trace_stop"() : () -> ()
    %148 = tpu.concatenate %84, %105, %126, %147 in 2 : vector<2x8x32xf32>, vector<2x8x32xf32>, vector<2x8x32xf32>, vector<2x8x32xf32> -> vector<2x8x128xf32>
    %149 = vector.shape_cast %148 : vector<2x8x128xf32> to vector<16x128xf32>
    %150 = arith.truncf %149 : vector<16x128xf32> to vector<16x128xbf16>
    %c0_57 = arith.constant 0 : index
    %c0_58 = arith.constant 0 : index
    %c0_59 = arith.constant 0 : index
    %151 = vector.load %arg13[%c0_57, %c0_58, %c0_59] : memref<1x128x128xbf16, #tpu.memory_space<vmem>>, vector<1x128x128xbf16>
    %152 = vector.shape_cast %151 : vector<1x128x128xbf16> to vector<128x128xbf16>
    %cst_60 = arith.constant dense<0.000000e+00> : vector<16x128xf32>
    %153 = tpu.matmul %150, %152, %cst_60 {dimension_numbers = #tpu.dot_dimension_numbers<[1], [0], [0], [1], [0, 0, 1, 1], [], []>} : vector<16x128xbf16>, vector<128x128xbf16>, vector<16x128xf32> -> vector<16x128xf32>
    %c0_61 = arith.constant 0 : index
    %c0_62 = arith.constant 0 : index
    %c0_63 = arith.constant 0 : index
    %154 = vector.load %arg14[%c0_61, %c0_62, %c0_63] : memref<1x1x128xf32, #tpu.memory_space<vmem>>, vector<1x1x128xf32>
    %155 = vector.shape_cast %154 : vector<1x1x128xf32> to vector<1x128xf32>
    %156 = vector.broadcast %155 : vector<1x128xf32> to vector<16x128xf32>
    %157 = arith.addf %153, %156 : vector<16x128xf32>
    %158 = arith.addf %10, %157 : vector<16x128xf32>
    %c0_64 = arith.constant 0 : index
    %c0_65 = arith.constant 0 : index
    %c0_66 = arith.constant 0 : index
    %159 = vector.load %arg15[%c0_64, %c0_65, %c0_66] : memref<1x1x128xf32, #tpu.memory_space<vmem>>, vector<1x1x128xf32>
    %160 = vector.shape_cast %159 : vector<1x1x128xf32> to vector<1x128xf32>
    %c0_67 = arith.constant 0 : index
    %c0_68 = arith.constant 0 : index
    %c0_69 = arith.constant 0 : index
    %161 = vector.load %arg16[%c0_67, %c0_68, %c0_69] : memref<1x1x128xf32, #tpu.memory_space<vmem>>, vector<1x1x128xf32>
    %162 = vector.shape_cast %161 : vector<1x1x128xf32> to vector<1x128xf32>
    %cst_70 = arith.constant dense<0.000000e+00> : vector<16xf32>
    %163 = vector.multi_reduction <add>, %158, %cst_70 [1] : vector<16x128xf32> to vector<16xf32>
    %164 = vector.shape_cast %163 : vector<16xf32> to vector<16x1xf32>
    %cst_71 = arith.constant 1.280000e+02 : f32
    %165 = vector.broadcast %cst_71 : f32 to vector<16x1xf32>
    %166 = arith.divf %164, %165 : vector<16x1xf32>
    %167 = vector.broadcast %166 : vector<16x1xf32> to vector<16x128xf32>
    %168 = arith.subf %158, %167 : vector<16x128xf32>
    %169 = arith.mulf %168, %168 : vector<16x128xf32>
    %cst_72 = arith.constant dense<0.000000e+00> : vector<16xf32>
    %170 = vector.multi_reduction <add>, %169, %cst_72 [1] : vector<16x128xf32> to vector<16xf32>
    %171 = vector.shape_cast %170 : vector<16xf32> to vector<16x1xf32>
    %cst_73 = arith.constant 1.280000e+02 : f32
    %172 = vector.broadcast %cst_73 : f32 to vector<16x1xf32>
    %173 = arith.divf %171, %172 : vector<16x1xf32>
    %174 = vector.broadcast %166 : vector<16x1xf32> to vector<16x128xf32>
    %175 = arith.subf %158, %174 : vector<16x128xf32>
    %cst_74 = arith.constant 9.99999997E-7 : f32
    %176 = vector.broadcast %cst_74 : f32 to vector<16x1xf32>
    %177 = arith.addf %173, %176 : vector<16x1xf32>
    %178 = math.rsqrt %177 : vector<16x1xf32>
    %179 = vector.broadcast %178 : vector<16x1xf32> to vector<16x128xf32>
    %180 = arith.mulf %175, %179 : vector<16x128xf32>
    %181 = vector.broadcast %160 : vector<1x128xf32> to vector<16x128xf32>
    %182 = arith.mulf %180, %181 : vector<16x128xf32>
    %183 = vector.broadcast %162 : vector<1x128xf32> to vector<16x128xf32>
    %184 = arith.addf %182, %183 : vector<16x128xf32>
    %185 = arith.truncf %184 : vector<16x128xf32> to vector<16x128xbf16>
    %c0_75 = arith.constant 0 : index
    %c0_76 = arith.constant 0 : index
    %c0_77 = arith.constant 0 : index
    %186 = vector.load %arg17[%c0_75, %c0_76, %c0_77] : memref<1x128x256xbf16, #tpu.memory_space<vmem>>, vector<1x128x256xbf16>
    %187 = vector.shape_cast %186 : vector<1x128x256xbf16> to vector<128x256xbf16>
    %cst_78 = arith.constant dense<0.000000e+00> : vector<16x256xf32>
    %188 = tpu.matmul %185, %187, %cst_78 {dimension_numbers = #tpu.dot_dimension_numbers<[1], [0], [0], [1], [0, 0, 1, 1], [], []>} : vector<16x128xbf16>, vector<128x256xbf16>, vector<16x256xf32> -> vector<16x256xf32>
    %c0_79 = arith.constant 0 : index
    %c0_80 = arith.constant 0 : index
    %c0_81 = arith.constant 0 : index
    %189 = vector.load %arg18[%c0_79, %c0_80, %c0_81] : memref<1x1x256xf32, #tpu.memory_space<vmem>>, vector<1x1x256xf32>
    %190 = vector.shape_cast %189 : vector<1x1x256xf32> to vector<1x256xf32>
    %191 = vector.broadcast %190 : vector<1x256xf32> to vector<16x256xf32>
    %192 = arith.addf %188, %191 : vector<16x256xf32>
    %cst_82 = arith.constant 0.000000e+00 : f32
    %193 = vector.broadcast %cst_82 : f32 to vector<16x256xf32>
    %194 = arith.maximumf %192, %193 : vector<16x256xf32>
    %195 = arith.truncf %194 : vector<16x256xf32> to vector<16x256xbf16>
    %c0_83 = arith.constant 0 : index
    %c0_84 = arith.constant 0 : index
    %c0_85 = arith.constant 0 : index
    %196 = vector.load %arg19[%c0_83, %c0_84, %c0_85] : memref<1x256x128xbf16, #tpu.memory_space<vmem>>, vector<1x256x128xbf16>
    %197 = vector.shape_cast %196 : vector<1x256x128xbf16> to vector<256x128xbf16>
    %cst_86 = arith.constant dense<0.000000e+00> : vector<16x128xf32>
    %198 = tpu.matmul %195, %197, %cst_86 {dimension_numbers = #tpu.dot_dimension_numbers<[1], [0], [0], [1], [0, 0, 1, 1], [], []>} : vector<16x256xbf16>, vector<256x128xbf16>, vector<16x128xf32> -> vector<16x128xf32>
    %c0_87 = arith.constant 0 : index
    %c0_88 = arith.constant 0 : index
    %c0_89 = arith.constant 0 : index
    %199 = vector.load %arg20[%c0_87, %c0_88, %c0_89] : memref<1x1x128xf32, #tpu.memory_space<vmem>>, vector<1x1x128xf32>
    %200 = vector.shape_cast %199 : vector<1x1x128xf32> to vector<1x128xf32>
    %201 = vector.broadcast %200 : vector<1x128xf32> to vector<16x128xf32>
    %202 = arith.addf %198, %201 : vector<16x128xf32>
    %203 = arith.addf %158, %202 : vector<16x128xf32>
    %204 = vector.shape_cast %203 : vector<16x128xf32> to vector<2x8x128xf32>
    %c0_90 = arith.constant 0 : index
    %c0_91 = arith.constant 0 : index
    %c0_92 = arith.constant 0 : index
    %205 = vector.load %arg24[%c0_90, %c0_91, %c0_92] : memref<2x8x128xf32, #tpu.memory_space<vmem>>, vector<2x8x128xf32>
    tpu.vector_store %arg24[%c0_90, %c0_91, %c0_92], %204 {strides = array<i32>} : memref<2x8x128xf32, #tpu.memory_space<vmem>>, vector<2x8x128xf32>,
    %c1_i32 = arith.constant 1 : i32
    %206 = arith.cmpi eq, %arg1, %c1_i32 : i32
    %207 = arith.extui %206 : i1 to i32
    %c0_i32_93 = arith.constant 0 : i32
    %208 = arith.cmpi ne, %207, %c0_i32_93 : i32
    scf.if %208 {
      %c0_94 = arith.constant 0 : index
      %c0_95 = arith.constant 0 : index
      %c0_96 = arith.constant 0 : index
      %209 = vector.load %arg24[%c0_94, %c0_95, %c0_96] : memref<2x8x128xf32, #tpu.memory_space<vmem>>, vector<2x8x128xf32>
      %210 = vector.shape_cast %209 : vector<2x8x128xf32> to vector<16x128xf32>
      %c0_97 = arith.constant 0 : index
      %c0_98 = arith.constant 0 : index
      %211 = vector.load %arg21[%c0_97, %c0_98] : memref<1x128xf32, #tpu.memory_space<vmem>>, vector<1x128xf32>
      %c0_99 = arith.constant 0 : index
      %c0_100 = arith.constant 0 : index
      %212 = vector.load %arg22[%c0_99, %c0_100] : memref<1x128xf32, #tpu.memory_space<vmem>>, vector<1x128xf32>
      %cst_101 = arith.constant dense<0.000000e+00> : vector<16xf32>
      %213 = vector.multi_reduction <add>, %210, %cst_101 [1] : vector<16x128xf32> to vector<16xf32>
      %214 = vector.shape_cast %213 : vector<16xf32> to vector<16x1xf32>
      %cst_102 = arith.constant 1.280000e+02 : f32
      %215 = vector.broadcast %cst_102 : f32 to vector<16x1xf32>
      %216 = arith.divf %214, %215 : vector<16x1xf32>
      %217 = vector.broadcast %216 : vector<16x1xf32> to vector<16x128xf32>
      %218 = arith.subf %210, %217 : vector<16x128xf32>
      %219 = arith.mulf %218, %218 : vector<16x128xf32>
      %cst_103 = arith.constant dense<0.000000e+00> : vector<16xf32>
      %220 = vector.multi_reduction <add>, %219, %cst_103 [1] : vector<16x128xf32> to vector<16xf32>
      %221 = vector.shape_cast %220 : vector<16xf32> to vector<16x1xf32>
      %cst_104 = arith.constant 1.280000e+02 : f32
      %222 = vector.broadcast %cst_104 : f32 to vector<16x1xf32>
      %223 = arith.divf %221, %222 : vector<16x1xf32>
      %224 = vector.broadcast %216 : vector<16x1xf32> to vector<16x128xf32>
      %225 = arith.subf %210, %224 : vector<16x128xf32>
      %cst_105 = arith.constant 9.99999997E-7 : f32
      %226 = vector.broadcast %cst_105 : f32 to vector<16x1xf32>
      %227 = arith.addf %223, %226 : vector<16x1xf32>
      %228 = math.rsqrt %227 : vector<16x1xf32>
      %229 = vector.broadcast %228 : vector<16x1xf32> to vector<16x128xf32>
      %230 = arith.mulf %225, %229 : vector<16x128xf32>
      %231 = vector.broadcast %211 : vector<1x128xf32> to vector<16x128xf32>
      %232 = arith.mulf %230, %231 : vector<16x128xf32>
      %233 = vector.broadcast %212 : vector<1x128xf32> to vector<16x128xf32>
      %234 = arith.addf %232, %233 : vector<16x128xf32>
      %235 = vector.shape_cast %234 : vector<16x128xf32> to vector<2x8x128xf32>
      %c0_106 = arith.constant 0 : index
      %c0_107 = arith.constant 0 : index
      %c0_108 = arith.constant 0 : index
      %236 = vector.load %arg23[%c0_106, %c0_107, %c0_108] : memref<2x8x128xf32, #tpu.memory_space<vmem>>, vector<2x8x128xf32>
      tpu.vector_store %arg23[%c0_106, %c0_107, %c0_108], %235 {strides = array<i32>} : memref<2x8x128xf32, #tpu.memory_space<vmem>>, vector<2x8x128xf32>,
    } else {
    }
    return
  }
  func.func @transform_0(%arg0: i32, %arg1: i32) -> (i32, i32, i32) {
    %c0_i32 = arith.constant 0 : i32
    %c0_i32_0 = arith.constant 0 : i32
    %c0_i32_1 = arith.constant 0 : i32
    return %arg0, %c0_i32, %c0_i32_0 : i32, i32, i32
  }
  func.func @transform_1(%arg0: i32, %arg1: i32) -> (i32, i32, i32) {
    %c0_i32 = arith.constant 0 : i32
    %c0_i32_0 = arith.constant 0 : i32
    %c0_i32_1 = arith.constant 0 : i32
    return %arg0, %c0_i32, %c0_i32_0 : i32, i32, i32
  }
  func.func @transform_2(%arg0: i32, %arg1: i32) -> (i32, i32) {
    %c0_i32 = arith.constant 0 : i32
    %c0_i32_0 = arith.constant 0 : i32
    %c0_i32_1 = arith.constant 0 : i32
    return %c0_i32, %c0_i32_0 : i32, i32
  }
  func.func @transform_3(%arg0: i32, %arg1: i32) -> (i32, i32, i32) {
    %c0_i32 = arith.constant 0 : i32
    %c0_i32_0 = arith.constant 0 : i32
    %c0_i32_1 = arith.constant 0 : i32
    return %arg1, %c0_i32, %c0_i32_0 : i32, i32, i32
  }
  func.func @transform_4(%arg0: i32, %arg1: i32) -> (i32, i32, i32) {
    %c0_i32 = arith.constant 0 : i32
    %c0_i32_0 = arith.constant 0 : i32
    %c0_i32_1 = arith.constant 0 : i32
    return %arg1, %c0_i32, %c0_i32_0 : i32, i32, i32
  }
  func.func @transform_5(%arg0: i32, %arg1: i32) -> (i32, i32, i32) {
    %c0_i32 = arith.constant 0 : i32
    %c0_i32_0 = arith.constant 0 : i32
    %c0_i32_1 = arith.constant 0 : i32
    return %arg1, %c0_i32, %c0_i32_0 : i32, i32, i32
  }
  func.func @transform_6(%arg0: i32, %arg1: i32) -> (i32, i32, i32) {
    %c0_i32 = arith.constant 0 : i32
    %c0_i32_0 = arith.constant 0 : i32
    %c0_i32_1 = arith.constant 0 : i32
    return %arg1, %c0_i32, %c0_i32_0 : i32, i32, i32
  }
  func.func @transform_7(%arg0: i32, %arg1: i32) -> (i32, i32, i32) {
    %c0_i32 = arith.constant 0 : i32
    %c0_i32_0 = arith.constant 0 : i32
    %c0_i32_1 = arith.constant 0 : i32
    return %arg1, %c0_i32, %c0_i32_0 : i32, i32, i32
  }
  func.func @transform_8(%arg0: i32, %arg1: i32) -> (i32, i32, i32) {
    %c0_i32 = arith.constant 0 : i32
    %c0_i32_0 = arith.constant 0 : i32
    %c0_i32_1 = arith.constant 0 : i32
    return %arg1, %c0_i32, %c0_i32_0 : i32, i32, i32
  }
  func.func @transform_9(%arg0: i32, %arg1: i32) -> (i32, i32, i32) {
    %c0_i32 = arith.constant 0 : i32
    %c0_i32_0 = arith.constant 0 : i32
    %c0_i32_1 = arith.constant 0 : i32
    return %arg1, %c0_i32, %c0_i32_0 : i32, i32, i32
  }
  func.func @transform_10(%arg0: i32, %arg1: i32) -> (i32, i32, i32) {
    %c0_i32 = arith.constant 0 : i32
    %c0_i32_0 = arith.constant 0 : i32
    %c0_i32_1 = arith.constant 0 : i32
    return %arg1, %c0_i32, %c0_i32_0 : i32, i32, i32
  }
  func.func @transform_11(%arg0: i32, %arg1: i32) -> (i32, i32, i32) {
    %c0_i32 = arith.constant 0 : i32
    %c0_i32_0 = arith.constant 0 : i32
    %c0_i32_1 = arith.constant 0 : i32
    return %arg1, %c0_i32, %c0_i32_0 : i32, i32, i32
  }
  func.func @transform_12(%arg0: i32, %arg1: i32) -> (i32, i32, i32) {
    %c0_i32 = arith.constant 0 : i32
    %c0_i32_0 = arith.constant 0 : i32
    %c0_i32_1 = arith.constant 0 : i32
    return %arg1, %c0_i32, %c0_i32_0 : i32, i32, i32
  }
  func.func @transform_13(%arg0: i32, %arg1: i32) -> (i32, i32, i32) {
    %c0_i32 = arith.constant 0 : i32
    %c0_i32_0 = arith.constant 0 : i32
    %c0_i32_1 = arith.constant 0 : i32
    return %arg1, %c0_i32, %c0_i32_0 : i32, i32, i32
  }
  func.func @transform_14(%arg0: i32, %arg1: i32) -> (i32, i32, i32) {
    %c0_i32 = arith.constant 0 : i32
    %c0_i32_0 = arith.constant 0 : i32
    %c0_i32_1 = arith.constant 0 : i32
    return %arg1, %c0_i32, %c0_i32_0 : i32, i32, i32
  }
  func.func @transform_15(%arg0: i32, %arg1: i32) -> (i32, i32, i32) {
    %c0_i32 = arith.constant 0 : i32
    %c0_i32_0 = arith.constant 0 : i32
    %c0_i32_1 = arith.constant 0 : i32
    return %arg1, %c0_i32, %c0_i32_0 : i32, i32, i32
  }
  func.func @transform_16(%arg0: i32, %arg1: i32) -> (i32, i32, i32) {
    %c0_i32 = arith.constant 0 : i32
    %c0_i32_0 = arith.constant 0 : i32
    %c0_i32_1 = arith.constant 0 : i32
    return %arg1, %c0_i32, %c0_i32_0 : i32, i32, i32
  }
  func.func @transform_17(%arg0: i32, %arg1: i32) -> (i32, i32, i32) {
    %c0_i32 = arith.constant 0 : i32
    %c0_i32_0 = arith.constant 0 : i32
    %c0_i32_1 = arith.constant 0 : i32
    return %arg1, %c0_i32, %c0_i32_0 : i32, i32, i32
  }
  func.func @transform_18(%arg0: i32, %arg1: i32) -> (i32, i32, i32) {
    %c0_i32 = arith.constant 0 : i32
    %c0_i32_0 = arith.constant 0 : i32
    %c0_i32_1 = arith.constant 0 : i32
    return %arg1, %c0_i32, %c0_i32_0 : i32, i32, i32
  }
  func.func @transform_19(%arg0: i32, %arg1: i32) -> (i32, i32) {
    %c0_i32 = arith.constant 0 : i32
    %c0_i32_0 = arith.constant 0 : i32
    %c0_i32_1 = arith.constant 0 : i32
    return %c0_i32, %c0_i32_0 : i32, i32
  }
  func.func @transform_20(%arg0: i32, %arg1: i32) -> (i32, i32) {
    %c0_i32 = arith.constant 0 : i32
    %c0_i32_0 = arith.constant 0 : i32
    %c0_i32_1 = arith.constant 0 : i32
    return %c0_i32, %c0_i32_0 : i32, i32
  }
  func.func @transform_21(%arg0: i32, %arg1: i32) -> (i32, i32, i32) {
    %c0_i32 = arith.constant 0 : i32
    %c0_i32_0 = arith.constant 0 : i32
    %c0_i32_1 = arith.constant 0 : i32
    return %arg0, %c0_i32, %c0_i32_0 : i32, i32, i32
  }
}

</mosaic_0001>

<bundles_post_ra>
// kernel: tpu_custom_call.1
= control target key start
LH: loop header
LB: loop body
LE: loop exit
PB: predicated region body
PF: predicated region fallthrough
CT: control target
= control target key end

     0   :  { %s4675_s0 = inlined_call_operand.hbm [shape: f32[2,8,128], index: 0, kind: input, shape index: {}]   ;;  %s4676_s1 = inlined_call_operand.hbm [shape: f32[2,1,8], index: 1, kind: input, shape index: {}]   ;;  %s4677_s2 = inlined_call_operand.hbm [shape: f32[8,128], index: 2, kind: input, shape index: {}]   ;;  %s4678_s3 = inlined_call_operand.vmem [shape: f32[2,1,128], index: 3, kind: input, shape index: {}]   ;;  %s4679_s4 = inlined_call_operand.hbm [shape: f32[2,1,128], index: 4, kind: input, shape index: {}]   ;;  %s4680_s5 = inlined_call_operand.hbm [shape: bf16[2,128,128], index: 5, kind: input, shape index: {}]   ;;  %s4681_s6 = inlined_call_operand.hbm [shape: f32[2,1,128], index: 6, kind: input, shape index: {}]   ;;  %s4682_s7 = inlined_call_operand.hbm [shape: bf16[2,128,128], index: 7, kind: input, shape index: {}]   ;;  %s4683_s8 = inlined_call_operand.hbm [shape: f32[2,1,128], index: 8, kind: input, shape index: {}]   ;;  %s4684_s9 = inlined_call_operand.hbm [shape: bf16[2,128,128], index: 9, kind: input, shape index: {}]   ;;  %s4685_s10 = inlined_call_operand.vmem [shape: f32[2,1,128], index: 10, kind: input, shape index: {}]   ;;  %s4686_s11 = inlined_call_operand.hbm [shape: bf16[2,128,128], index: 11, kind: input, shape index: {}]   ;;  %s4687_s12 = inlined_call_operand.vmem [shape: f32[2,1,128], index: 12, kind: input, shape index: {}]   ;;  %s4688_s13 = inlined_call_operand.vmem [shape: f32[2,1,128], index: 13, kind: input, shape index: {}]   ;;  %s4689_s14 = inlined_call_operand.hbm [shape: f32[2,1,128], index: 14, kind: input, shape index: {}]   ;;  %s4690_s15 = inlined_call_operand.hbm [shape: bf16[2,128,256], index: 15, kind: input, shape index: {}]   ;;  %s4691_s16 = inlined_call_operand.vmem [shape: f32[2,1,256], index: 16, kind: input, shape index: {}]   ;;  %s4692_s17 = inlined_call_operand.hbm [shape: bf16[2,256,128], index: 17, kind: input, shape index: {}]   ;;  %s4693_s18 = inlined_call_operand.vmem [shape: f32[2,1,128], index: 18, kind: input, shape index: {}]   ;;  %s4694_s19 = inlined_call_operand.vmem [shape: f32[1,128], index: 19, kind: input, shape index: {}]   ;;  %s4695_s20 = inlined_call_operand.vmem [shape: f32[1,128], index: 20, kind: input, shape index: {}]   ;;  %s4696_s21 = inlined_call_operand.hbm [shape: f32[2,8,128], index: 21, kind: output, shape index: {}]  }
   0x1   :  { %4714 = sst [smem:[#allocation41_spill]] %s4675_s0 }
   0x2   :  { %4715 = sst [smem:[#allocation42_spill]] %s4676_s1 }
   0x3   :  { %4716 = sst [smem:[#allocation43_spill]] %s4677_s2 }
   0x4   :  { %4717 = sst [smem:[#allocation44_spill]] %s4678_s3 }
   0x5   :  { %4718 = sst [smem:[#allocation45_spill]] %s4679_s4 }
   0x6   :  { %4719 = sst [smem:[#allocation46_spill]] %s4680_s5 }
   0x7   :  { %4720 = sst [smem:[#allocation47_spill]] %s4681_s6 }
   0x8   :  { %4721 = sst [smem:[#allocation48_spill]] %s4682_s7 }
   0x9   :  { %4722 = sst [smem:[#allocation49_spill]] %s4683_s8 }
   0xa   :  { %4723 = sst [smem:[#allocation50_spill]] %s4684_s9 }
   0xb   :  { %4724 = sst [smem:[#allocation51_spill]] %s4685_s10 }
   0xc   :  { %4725 = sst [smem:[#allocation52_spill]] %s4686_s11 }
   0xd   :  { %4726 = sst [smem:[#allocation53_spill]] %s4687_s12 }
   0xe   :  { %4727 = sst [smem:[#allocation54_spill]] %s4688_s13 }
   0xf   :  { %4728 = sst [smem:[#allocation55_spill]] %s4689_s14 }
  0x10   :  { %4729 = sst [smem:[#allocation56_spill]] %s4690_s15 }
  0x11   :  { %4730 = sst [smem:[#allocation57_spill]] %s4691_s16 }
  0x12   :  { %4731 = sst [smem:[#allocation58_spill]] %s4692_s17 }
  0x13   :  { %4732 = sst [smem:[#allocation59_spill]] %s4693_s18 }
  0x14   :  { %4733 = sst [smem:[#allocation60_spill]] %s4694_s19 }
  0x15   :  { %4734 = sst [smem:[#allocation61_spill]] %s4695_s20 }
  0x16   :  { %4735 = sst [smem:[#allocation62_spill]] %s4696_s21 }
  0x17   :  { %26 = vsyncpa [#allocation4], 0 }
  0x18   :  { %27 = vsyncpa [#allocation7], 0 }
  0x19   :  { %28 = vsyncpa [#allocation10], 0 }
  0x1a   :  { %30 = vsyncpa [#allocation10 + $0x1], 0 }
  0x1b   :  { %31 = vsyncpa [#allocation13], 0 }
  0x1c   :  { %33 = vsyncpa [#allocation13 + $0x1], 0 }
  0x1d   :  { %34 = vsyncpa [#allocation16], 0 }
  0x1e   :  { %36 = vsyncpa [#allocation16 + $0x1], 0 }
  0x1f   :  { %37 = vsyncpa [#allocation19], 0 }
  0x20   :  { %39 = vsyncpa [#allocation19 + $0x1], 0 }
  0x21   :  { %40 = vsyncpa [#allocation22], 0 }
  0x22   :  { %42 = vsyncpa [#allocation22 + $0x1], 0 }
  0x23   :  { %43 = vsyncpa [#allocation5], 0  ;;  %s4071_s2 = smov 0   ;;  %s4073_s25 = smov 0  }
  0x24   :  { %s4075_s26 = smov 0   ;;  %s4077_s27 = smov 0  }
  0x25   :  { %s4079_s3 = smov 0   ;;  %s4081_s28 = smov 0  }
  0x26 LB: > { %4736 = sst [smem:[#allocation33_spill]] %s3926_s25  ;;  %s4100_s29 = sadd.s32 4294967295, %s3942_s28   ;;  %s3942_s28 = sphi %s4081_s28, %s49_s28   ;;  %s3938_s3 = sphi %s4079_s3, %s4797_s3   ;;  %s3934_s27 = sphi %s4077_s27, %s4796_s27   ;;  %s3930_s26 = sphi %s4075_s26, %s4795_s26   ;;  %s3926_s25 = sphi %s4073_s25, %s4794_s25   ;;  %s3922_s2 = sphi %s4071_s2, %s4793_s2  }
  0x27   : > { %4737 = sst [smem:[#allocation34_spill]] %s3930_s26  ;;  %p180_p0 = scmp.ne.s32.totalorder %s3926_s25, %s3922_s2 }
  0x28   : > { %4738 = sst [smem:[#allocation35_spill]] %s3934_s27  ;;  %p181_p1 = scmp.eq.s32.totalorder %s4100_s29, 0 }
  0x29   : > { %4739 = sst [smem:[#allocation36_spill]] %s3938_s3  ;;  %p2841_p2 = scmp.ge.s32.totalorder %s3942_s28, 1 }
  0x2a   : > { %4740 = sst [smem:[#allocation37_spill]] %s3942_s28  ;;  %p623_p3 = scmp.lt.s32.totalorder %s3942_s28, 3 }
  0x2b   : > { %p4108_p4 = por %p181_p1, %p180_p0  ;;  %s4743_s5 = sld [smem:[#allocation42_spill]] }
  0x2c   : > { %p4115_p5 = pnand %p2841_p2, %p623_p3  ;;  %s3944_s1 = smov [#allocation6]  }
  0x2d   : > { %s4741_s0 = scalar_select %p4108_p4, 1, 0 }
  0x2e   : > { %p3259_p6 = pneg %p4115_p5  ;;  %s655_s24 = sshll.u32 %s3944_s1, 4  ;;  %s656_s24 = int_to_ptr.vmem [resolvable:$true] %s655_s24 }
  0x2f   : > { %4742 = sst [smem:[#allocation38_spill]] %s4741_s0  ;;  %s3945_s4 = smov 16  }
  0x30   : > { %p4123_p7 = pnand %p3259_p6, %p181_p1  ;;  %s3946_s30 = smov 1  }
  0x31   : > { %s653_s22 = sshll.u32 %s4743_s5, 4  ;;  %s58_s5 = sadd.s32 1, %s3938_s3  ;;  %s654_s22 = int_to_ptr.hbm [resolvable:$true] %s653_s22 }
  0x32   : > { %3265 = dma.hbm_to_vmem [thread:$0]  (!%p4123_p7), %s654_s22, 32, %s656_s24, [#allocation7], %s3945_s4, %s3945_s4, %s3946_s30  }
  0x33   : > { %p59_p8 = scmp.ge.s32.totalorder %s58_s5, 2  ;;  %s167_s21 = sadd.s32 1, %s3930_s26 }
  0x34   : > { %p174_p9 = scmp.ne.s32.totalorder %s3930_s26, %s3926_s25  ;;  %p175_p10 = scmp.eq.s32.totalorder %s3942_s28, 0 }
  0x35   : > { %s4799_s5 = smov (%p59_p8, %s58_s5), 0  ;;  %p3303_p12 = scmp.lt.s32.totalorder %s3942_s28, 2 }
  0x36   : > { %4746 = sst [smem:[#allocation39_spill]] %s4799_s5  ;;  %p4136_p11 = por %p175_p10, %p174_p9 }
  0x37   : > { %s164_s20 = ssub.s32 %s3938_s3, %s4799_s5  ;;  %s4144_s19 = sand.u32 1, %s3942_s28  }
  0x38   : > { %p165_p13 = scmp.eq.s32.totalorder %s164_s20, 0  ;;  %s4147_s22 = sand.u32 1, %s3930_s26  }
  0x39   : > { %s4748_s30 = sld [smem:[#allocation45_spill]]  ;;  %s696_s5 = scalar_lea.vmem [#allocation9], %s4147_s22 }
  0x3a   : > { %s4154_s18 = scalar_select %p165_p13, %s3930_s26, %s167_s21  }
  0x3b   : > { %s703_s28 = sshll.u32 %s696_s5, 4  ;;  %p4159_p0 = pnand %p3303_p12, %p4136_p11  ;;  %s704_s28 = int_to_ptr.vmem [resolvable:$true] %s703_s28 }
  0x3c   : > { %4749 = sst [smem:[#allocation40_spill]] %s4154_s18  ;;  %s735_s5 = scalar_lea.vmem [#allocation12], %s4147_s22 }
  0x3d   : > { %s4751_s6 = sld [smem:[#allocation47_spill]]  ;;  %s742_s1 = sshll.u32 %s735_s5, 4  ;;  %s743_s1 = int_to_ptr.vmem [resolvable:$true] %s742_s1 }
  0x3e   : > { %s4700_s18 = scalar_lea.sflag [#allocation13], %s4144_s19  ;;  %s4752_s8 = sld [smem:[#allocation49_spill]] }
  0x3f   : > { %s699_s16 = scalar_lea.hbm %s4748_s30, %s3938_s3  ;;  %s4701_s30 = scalar_lea.sflag [#allocation10], %s4144_s19 }
  0x40   : > { %s701_s13 = sshll.u32 %s699_s16, 4  ;;  %s774_s26 = scalar_lea.vmem [#allocation15], %s4147_s22  ;;  %s702_s13 = int_to_ptr.hbm [resolvable:$true] %s701_s13 }
  0x41   : > { %3272 = dma.hbm_to_vmem [thread:$0]  (!%p4159_p0), %s702_s13, 16, %s704_s28, %s4701_s30  }
  0x42   : > { %s781_s12 = sshll.u32 %s774_s26, 4  ;;  %s4184_s28 = sshll.u32 %s4147_s22, 6  ;;  %s782_s12 = int_to_ptr.vmem [resolvable:$true] %s781_s12 }
  0x43   : > { %s738_s21 = scalar_lea.hbm %s4751_s6, %s3938_s3  ;;  %s4753_s11 = sld [smem:[#allocation52_spill]] }
  0x44   : > { %s740_s16 = sshll.u32 %s738_s21, 4  ;;  %s777_s6 = scalar_lea.hbm %s4752_s8, %s3938_s3  ;;  %s741_s16 = int_to_ptr.hbm [resolvable:$true] %s740_s16 }
  0x45   : > { %3278 = dma.hbm_to_vmem [thread:$0]  (!%p4159_p0), %s741_s16, 16, %s743_s1, %s4700_s18  }
  0x46   : > { %s779_s13 = sshll.u32 %s777_s6, 4  ;;  %s4702_s21 = scalar_lea.sflag [#allocation16], %s4144_s19  ;;  %s780_s13 = int_to_ptr.hbm [resolvable:$true] %s779_s13 }
  0x47   : > { %3284 = dma.hbm_to_vmem [thread:$0]  (!%p4159_p0), %s780_s13, 16, %s782_s12, %s4702_s21  }
  0x48   : > { %s4192_s16 = sshll.u32 %s3938_s3, 6  ;;  %s820_s24 = scalar_lea.vmem [#allocation18], %s4184_s28 }
  0x49   : > { %s825_s6 = scalar_lea.hbm %s4753_s11, %s4192_s16  ;;  %s828_s4 = sshll.u32 %s820_s24, 4  ;;  %s829_s4 = int_to_ptr.vmem [resolvable:$true] %s828_s4 }
  0x4a   : > { %s826_s26 = sshll.u32 %s825_s6, 4  ;;  %s4707_s18 = scalar_lea.sflag [#allocation19], %s4144_s19  ;;  %s827_s26 = int_to_ptr.hbm [resolvable:$true] %s826_s26 }
  0x4b   : > { %s4708_s30 = smov 64   ;;  %s4710_s8 = smov 4  }
  0x4c   : > { %3290 = dma.hbm_to_vmem [thread:$0]  (!%p4159_p0), %s827_s26, 1024, %s829_s4, %s4707_s18, %s4708_s30, %s4708_s30, %s4710_s8  }
  0x4d   : > { %s2858_s12 = sshll.u32 %s4147_s22, 7  ;;  %s3157_s13 = sshll.u32 %s3938_s3, 7 }
  0x4e   : > { %s4754_s15 = sld [smem:[#allocation56_spill]]  ;;  %s871_s24 = scalar_lea.vmem [#allocation21], %s2858_s12 }
  0x4f   : > { %s879_s21 = sshll.u32 %s871_s24, 4  ;;  %s4712_s10 = scalar_lea.sflag [#allocation22], %s4144_s19  ;;  %s880_s21 = int_to_ptr.vmem [resolvable:$true] %s879_s21 }
  0x50   : > { %s3949_s27 = smov 128   ;;  %s3950_s0 = smov 8  }
  0x51   : > { %s4755_s17 = sld [smem:[#allocation58_spill]]  ;;  %s900_s18 = scalar_lea.vmem [#allocation23], %s2858_s12 }
  0x52   : > { %s908_s5 = sshll.u32 %s900_s18, 4  ;;  %s4756_s30 = sld [smem:[#allocation41_spill]]  ;;  %s4220_s5 = int_to_ptr.vmem [resolvable:$true] %s908_s5 }
  0x53   : > { %s4757_s12 = sld [smem:[#allocation43_spill]]  ;;  %s3952_s26 = smov [#allocation8]  }
  0x54   : > { %s876_s6 = scalar_lea.hbm %s4754_s15, %s3157_s13  ;;  %s4762_s7 = sld [smem:[#allocation48_spill]] }
  0x55   : > { %s877_s11 = sshll.u32 %s876_s6, 4  ;;  %s753_s2 = scalar_lea.vmem [#allocation14], %s4184_s28  ;;  %s878_s11 = int_to_ptr.hbm [resolvable:$true] %s877_s11 }
  0x56   : > { %3296 = dma.hbm_to_vmem [thread:$0]  (!%p4159_p0), %s878_s11, 2048, %s880_s21, %s4712_s10, %s3949_s27, %s3949_s27, %s3950_s0  }
  0x57   : > { %s905_s4 = scalar_lea.hbm %s4755_s17, %s3157_s13  ;;  %s3951_s11 = smov [#allocation3]  }
  0x58   : > { %s906_s1 = sshll.u32 %s905_s4, 4  ;;  %s637_s8 = sshll.u32 %s4756_s30, 4  ;;  %s4222_s1 = int_to_ptr.hbm [resolvable:$true] %s906_s1  ;;  %s638_s8 = int_to_ptr.hbm [resolvable:$true] %s637_s8 }
  0x59   : > { %s639_s25 = sshll.u32 %s3951_s11, 4  ;;  %s668_s18 = sshll.u32 %s4757_s12, 4  ;;  %s640_s25 = int_to_ptr.vmem [resolvable:$true] %s639_s25  ;;  %s669_s18 = int_to_ptr.hbm [resolvable:$true] %s668_s18 }
  0x5a   : > { %3262 = dma.hbm_to_vmem [thread:$0]  (!%p4123_p7), %s638_s8, 256, %s640_s25, [#allocation4], %s3949_s27, %s3949_s27, %s3950_s0  }
  0x5b   : > { %s670_s4 = sshll.u32 %s3952_s26, 4  ;;  %s4758_s30 = sld [smem:[#allocation46_spill]]  ;;  %s671_s4 = int_to_ptr.vmem [resolvable:$true] %s670_s4 }
  0x5c   : > { %3268 = dma.hbm_to_vmem [thread:$0]  (!%p4123_p7), %s669_s18, 128, %s671_s4, [#allocation7]  }
  0x5d   : > { %s714_s21 = scalar_lea.vmem [#allocation11], %s4184_s28  ;;  %s4759_s8 = smov 4  }
  0x5e   : > { %s722_s13 = sshll.u32 %s714_s21, 4  ;;  %s4760_s27 = smov 64   ;;  %s723_s13 = int_to_ptr.vmem [resolvable:$true] %s722_s13 }
  0x5f   : > { %s4761_s0 = scalar_lea.sflag [#allocation10], %s4144_s19  ;;  %s761_s18 = sshll.u32 %s753_s2, 4  ;;  %s762_s18 = int_to_ptr.vmem [resolvable:$true] %s761_s18 }
  0x60   : > { %s4763_s4 = scalar_lea.sflag [#allocation13], %s4144_s19  ;;  %s4764_s9 = sld [smem:[#allocation50_spill]] }
  0x61   : > { %s719_s10 = scalar_lea.hbm %s4758_s30, %s4192_s16  ;;  %s4766_s14 = sld [smem:[#allocation55_spill]] }
  0x62   : > { %s720_s11 = sshll.u32 %s719_s10, 4  ;;  %s758_s10 = scalar_lea.hbm %s4762_s7, %s4192_s16  ;;  %s721_s11 = int_to_ptr.hbm [resolvable:$true] %s720_s11 }
  0x63   : > { %3275 = dma.hbm_to_vmem [thread:$0]  (!%p4159_p0), %s721_s11, 1024, %s723_s13, %s4761_s0, %s4760_s27, %s4760_s27, %s4759_s8  }
  0x64   : > { %s759_s26 = sshll.u32 %s758_s10, 4  ;;  %s792_s11 = scalar_lea.vmem [#allocation17], %s4184_s28  ;;  %s760_s26 = int_to_ptr.hbm [resolvable:$true] %s759_s26 }
  0x65   : > { %3281 = dma.hbm_to_vmem [thread:$0]  (!%p4159_p0), %s760_s26, 1024, %s762_s18, %s4763_s4, %s4760_s27, %s4760_s27, %s4759_s8  }
  0x66   : > { %s797_s30 = scalar_lea.hbm %s4764_s9, %s4192_s16  ;;  %s800_s21 = sshll.u32 %s792_s11, 4  ;;  %s801_s21 = int_to_ptr.vmem [resolvable:$true] %s800_s21 }
  0x67   : > { %s798_s13 = sshll.u32 %s797_s30, 4  ;;  %s4765_s0 = scalar_lea.sflag [#allocation16], %s4144_s19  ;;  %s799_s13 = int_to_ptr.hbm [resolvable:$true] %s798_s13 }
  0x68   : > { %3287 = dma.hbm_to_vmem [thread:$0]  (!%p4159_p0), %s799_s13, 1024, %s801_s21, %s4765_s0, %s4760_s27, %s4760_s27, %s4759_s8  }
  0x69   : > { %s856_s10 = scalar_lea.hbm %s4766_s14, %s3938_s3  ;;  %s853_s2 = scalar_lea.vmem [#allocation20], %s4147_s22 }
  0x6a   : > { %s860_s18 = sshll.u32 %s853_s2, 4  ;;  %s858_s26 = sshll.u32 %s856_s10, 4  ;;  %s861_s18 = int_to_ptr.vmem [resolvable:$true] %s860_s18  ;;  %s859_s26 = int_to_ptr.hbm [resolvable:$true] %s858_s26 }
  0x6b   : > { %s4767_s28 = scalar_lea.sflag [#allocation19], %s4144_s19  ;;  %s4768_s16 = scalar_lea.sflag [#allocation22], %s4144_s19 }
  0x6c   : > { %3293 = dma.hbm_to_vmem [thread:$0]  (!%p4159_p0), %s859_s26, 16, %s861_s18, %s4767_s28  }
  0x6d   : > { %3299 = dma.hbm_to_vmem [thread:$0]  (!%p4159_p0), %s4222_s1, 2048, %s4220_s5, %s4768_s16, %s4760_s27, %s4760_s27, %s4759_s8  }
  0x6e   : > { %926 = sbr.rel (%p4115_p5) target bundleno = 2354 (0x932), region = 104 }
  0x73   : > { %3889 = dma.done.wait (%p181_p1), [#allocation4], 256  }
  0x74   : > { %3891 = vsyncadd (%p181_p1), [#allocation4], 4294967040 }
  0x75   : > { %3893 = dma.done.wait (%p181_p1), [#allocation7], 160  }
  0x76   : > { %3895 = vsyncadd (%p181_p1), [#allocation7], 4294967136  ;;  %s4769_s22 = sld [smem:[#allocation33_spill]]  ;;  %s943_s19 = sand.u32 1, %s4100_s29  }
  0x77   : > { %s944_s23 = scalar_lea.sflag [#allocation10], %s943_s19 }
  0x7c   : > { %s4300_s5 = sand.u32 1, %s4769_s22  }
  0x7d   : > { %3897 = dma.done.wait (%p4108_p4), %s944_s23, 1040  }
  0x7e   : > { %3899 = vsyncadd (%p4108_p4), %s944_s23, 4294966256  ;;  %s2868_s8 = sshll.u32 %s4300_s5, 6  ;;  %s963_s4 = scalar_lea.sflag [#allocation13], %s943_s19 }
  0x7f   : > { %s4308_s27 = scalar_lea.vmem [#allocation11], %s2868_s8 }
  0x80   : > { %3901 = dma.done.wait (%p4108_p4), %s963_s4, 1040  }
  0x81   : > { %3903 = vsyncadd (%p4108_p4), %s963_s4, 4294966256  ;;  %s4315_s24 = scalar_lea.vmem [#allocation14], %s2868_s8  ;;  %s982_s30 = scalar_lea.sflag [#allocation16], %s943_s19 }
  0x82   : > { %3905 = dma.done.wait (%p4108_p4), %s982_s30, 1040  }
  0x83   : > { %3907 = vsyncadd (%p4108_p4), %s982_s30, 4294966256  ;;  %s4322_s21 = scalar_lea.vmem [#allocation17], %s2868_s8  ;;  %s1001_s13 = scalar_lea.sflag [#allocation19], %s943_s19 }
  0x84   : > { %s4324_s0 = scalar_lea.vmem [#allocation18], %s2868_s8 }
  0x85   : > { %3909 = dma.done.wait (%p4108_p4), %s1001_s13, 1040  }
  0x86   : > { %3911 = vsyncadd (%p4108_p4), %s1001_s13, 4294966256  ;;  %s2872_s25 = sshll.u32 %s4300_s5, 7  ;;  %s1020_s10 = scalar_lea.sflag [#allocation22], %s943_s19 }
  0x87   : > { %s4332_s2 = scalar_lea.vmem [#allocation21], %s2872_s25 }
  0x88   : > { %3913 = dma.done.wait (%p4108_p4), %s1020_s10, 4096  }
  0x89   : > { %3915 = vsyncadd (%p4108_p4), %s1020_s10, 4294963200  ;;  %s4771_s18 = sld [smem:[#allocation35_spill]]  ;;  %s4368_s23 = scalar_lea.vmem [#allocation23], %s2872_s25 }
  0x8a   : > { %s4773_s4 = sld [smem:[#allocation51_spill]] }
  0x8b   : > { %s4774_s10 = sld [smem:[#allocation53_spill]] }
  0x8c   : > { %s4775_s1 = sld [smem:[#allocation54_spill]] }
  0x8d   : > { %s4776_s14 = sld [smem:[#allocation59_spill]] }
  0x8e   : > { %s4777_s22 = sld [smem:[#allocation57_spill]] }
  0x8f   : > { %p1150_p1 = scmp.lt.s32.totalorder %s4771_s18, 1  ;;  %p2875_p2 = scmp.ne.s32.totalorder %s4771_s18, 0 }
  0x91   : > { %s4340_s26 = scalar_select %p1150_p1, %s4771_s18, 1 }
  0x92   : > { %1174 = sbr.rel (%p2875_p2) target bundleno = 156 (0x9c), region = 160 }
  0x93   : > { %s1155_s20 = scalar_lea.vmem %s4773_s4, %s4340_s26  ;;  %s1158_s12 = scalar_lea.vmem %s4774_s10, %s4340_s26 }
  0x94   : > { %s1161_s7 = scalar_lea.vmem %s4775_s1, %s4340_s26  ;;  %s2874_s9 = sshll.u32 %s4340_s26, 1 }
  0x95   : > { %s1168_s15 = scalar_lea.vmem %s4776_s14, %s4340_s26  ;;  %s4366_s19 = scalar_lea.vmem %s4777_s22, %s2874_s9 }
  0x97   : > { %v1175_v0 = vld [vmem:[#allocation3] sm:$0xff]  ;;  %v1177_v1 = vld [vmem:[#allocation8] sm:$0xff]  ;;  %v1176_v2 = vld [vmem:[#allocation3 + $0x8] sm:$0xff] }
  0x98   : > { %v1178_v3 = vadd.f32 %v1177_v1, %v1175_v0  ;;  %v1179_v4 = vadd.f32 %v1177_v1, %v1176_v2 }
  0x9a   : > { %1180 = vst [vmem:[#allocation2] sm:$0xff] %v1178_v3 }
  0x9b   : > { %1181 = vst [vmem:[#allocation2 + $0x8] sm:$0xff] %v1179_v4 }
  0x9c PF: > { %v3953_v7 = vmov 128.0   ;;  %v3166_v22 = vld [vmem:[%s4308_s27 + $0x38] sm:$0xff]  ;;  %v3165_v25 = vld [vmem:[%s4308_s27 + $0x30] sm:$0xff]  ;;  %v3164_v28 = vld [vmem:[%s4308_s27 + $0x28] sm:$0xff]  ;;  %s4778_s17 = sld [smem:[#allocation44_spill]]  ;;  %s4780_s1 = scalar_lea.vmem [#allocation9], %s4300_s5 }
  0x9d   : > { %3398 = vrcp.f32 %v3953_v7  ;;  %v3174_v23 = vld [vmem:[%s4315_s24 + $0x38] sm:$0xff]  ;;  %1318 = vmatpush.bf16.msra.mxu0 %v3166_v22  ;;  %v3173_v26 = vld [vmem:[%s4315_s24 + $0x30] sm:$0xff]  ;;  %v3172_v29 = vld [vmem:[%s4315_s24 + $0x28] sm:$0xff]  ;;  %s4782_s6 = scalar_lea.vmem [#allocation15], %s4300_s5  ;;  %vm1510_vm7 = vcmask 261120   ;;  %s3954_s25 = smov 96  }
  0x9e   : > { %v3182_v24 = vld [vmem:[%s4322_s21 + $0x38] sm:$0xff]  ;;  %1400 = vmatpush.bf16.msra.mxu1 %v3174_v23  ;;  %v3181_v27 = vld [vmem:[%s4322_s21 + $0x30] sm:$0xff]  ;;  %v3180_v30 = vld [vmem:[%s4322_s21 + $0x28] sm:$0xff]  ;;  %vm1577_vm8 = vcmask 1043456   ;;  %s3955_s18 = smov 64   ;;  %s3956_s8 = smov 32  }
  0x9f   : > { %1482 = vmatpush.bf16.msra.mxu2 %v3182_v24  ;;  %v3163_v31 = vld [vmem:[%s4308_s27 + $0x20] sm:$0xff]  ;;  %v3162_v34 = vld [vmem:[%s4308_s27 + $0x18] sm:$0xff]  ;;  %v3161_v37 = vld [vmem:[%s4308_s27 + $0x10] sm:$0xff]  ;;  %vm1549_vm10 = vcmask 64512   ;;  %vm1993_vm12 = vcmask 523264   ;;  %vm1996_vm13 = vcmask 785408  }
  0xa0   : > { %v3171_v32 = vld [vmem:[%s4315_s24 + $0x20] sm:$0xff]  ;;  %v3170_v35 = vld [vmem:[%s4315_s24 + $0x18] sm:$0xff]  ;;  %v3169_v38 = vld [vmem:[%s4315_s24 + $0x10] sm:$0xff]  ;;  %s4786_s13 = scalar_lea.vmem [#allocation20], %s4300_s5  ;;  %s4788_s10 = sld [smem:[#allocation35_spill]] }
  0xa1   : > { %v4371_v5 = vld [vmem:[#allocation2] sm:$0xff]  ;;  %1319 = vmatpush.bf16.msra.mxu0 %v3165_v25  ;;  %v3179_v33 = vld [vmem:[%s4322_s21 + $0x20] sm:$0xff]  ;;  %v3178_v36 = vld [vmem:[%s4322_s21 + $0x18] sm:$0xff] }
  0xa2   : > { %1192 = vadd.xlane.f32.xlu0 %v4371_v5  ;;  %v4374_v6 = vld [vmem:[#allocation2 + $0x8] sm:$0xff]  ;;  %1401 = vmatpush.bf16.msra.mxu1 %v3173_v26  ;;  %v3177_v39 = vld [vmem:[%s4322_s21 + $0x10] sm:$0xff]  ;;  %v3160_v40 = vld [vmem:[%s4308_s27 + $0x8] sm:$0xff]  ;;  %s4779_s3 = scalar_lea.vmem %s4778_s17, %s4340_s26 }
  0xa3   : > { %v3399_v8 = vpop.eup %3398  ;;  %1483 = vmatpush.bf16.msra.mxu2 %v3181_v27  ;;  %v3168_v41 = vld [vmem:[%s4315_s24 + $0x8] sm:$0xff]  ;;  %v3159_v44 = vld [vmem:[%s4308_s27] sm:$0xff]  ;;  %v3389_v1 = vld [vmem:[%s4779_s3] ss:$0 sm:$0xff]  ;;  %s4781_s27 = scalar_lea.vmem [#allocation12], %s4300_s5 }
  0xa4   : > { %v1197_v9 = vmul.f32 128.0, %v3399_v8  ;;  %vm1201_vm0 = vweird.f32 %v3399_v8  ;;  %v3176_v42 = vld [vmem:[%s4322_s21 + $0x8] sm:$0xff]  ;;  %v3167_v45 = vld [vmem:[%s4315_s24] sm:$0xff]  ;;  %v3393_v22 = vld [vmem:[%s1155_s20] ss:$0 sm:$0xff] }
  0xa5   : > { %1320 = vmatpush.bf16.msra.mxu0 %v3164_v28  ;;  %v3175_v47 = vld [vmem:[%s4322_s21] sm:$0xff] }
  0xa6   : > { %v1198_v10 = vsub.f32 1.0, %v1197_v9  ;;  %1402 = vmatpush.bf16.msra.mxu1 %v3172_v29  ;;  %p3148_p3 = scmp.ne.s32.totalorder %s4788_s10, 1 }
  0xa7   : > { %1484 = vmatpush.bf16.msra.mxu2 %v3180_v30  ;;  %s4789_s28 = sld [smem:[#allocation60_spill]] (!%p3148_p3) }
  0xa8   : > { %v1199_v11 = vmul.f32 %v3399_v8, %v1198_v10 }
  0xa9   : > { %1321 = vmatpush.bf16.msra.mxu0 %v3163_v31 }
  0xaa   : > { %1194 = vadd.xlane.f32.xlu0 %v4374_v6  ;;  %v1200_v12 = vadd.f32 %v3399_v8, %v1199_v11  ;;  %1403 = vmatpush.bf16.msra.mxu1 %v3171_v32 }
  0xab   : > { %1485 = vmatpush.bf16.msra.mxu2 %v3179_v33 }
  0xac   : > { %v4377_v13 = vsel %vm1201_vm0, %v3399_v8, %v1200_v12  ;;  %v3390_v8 = vld [vmem:[%s4780_s1] ss:$0 sm:$0xff] }
  0xad   : > { %1322 = vmatpush.bf16.msra.mxu0 %v3162_v34 }
  0xae   : > { %1404 = vmatpush.bf16.msra.mxu1 %v3170_v35 }
  0xaf   : > { %1486 = vmatpush.bf16.msra.mxu2 %v3178_v36 }
  0xb1   : > { %1323 = vmatpush.bf16.msra.mxu0 %v3161_v37 }
  0xb2   : > { %1405 = vmatpush.bf16.msra.mxu1 %v3169_v38 }
  0xb3   : > { %1487 = vmatpush.bf16.msra.mxu2 %v3177_v39 }
  0xb5   : > { %1324 = vmatpush.bf16.msra.mxu0 %v3160_v40 }
  0xb6   : > { %1406 = vmatpush.bf16.msra.mxu1 %v3168_v41 }
  0xb7   : > { %1488 = vmatpush.bf16.msra.mxu2 %v3176_v42 }
  0xb9   : > { %1325 = vmatpush.bf16.msra.mxu0 %v3159_v44 }
  0xba   : > { %1407 = vmatpush.bf16.msra.mxu1 %v3167_v45 }
  0xbb   : > { %1489 = vmatpush.bf16.msra.mxu2 %v3175_v47 }
 0x115   : > { %v1193_v14 = vpop.xlane.xlu0 %1192 }
 0x116   : > { %v1203_v15 = vmul.f32 %v4377_v13, %v1193_v14  ;;  %v3391_v14 = vld [vmem:[%s4781_s27] ss:$0 sm:$0xff] }
 0x118   : > { %v4381_v16 = vsub.f32 %v4371_v5, %v1203_v15  ;;  %v3392_v15 = vld [vmem:[%s4782_s6] ss:$0 sm:$0xff] }
 0x11a   : > { %v1207_v17 = vmul.f32 %v4381_v16, %v4381_v16 }
 0x11c   : > { %1209 = vadd.xlane.f32.xlu1 %v1207_v17 }
 0x11d   : > { %v1195_v18 = vpop.xlane.xlu0 %1194 }
 0x11e   : > { %v1204_v19 = vmul.f32 %v4377_v13, %v1195_v18 }
 0x120   : > { %v4387_v20 = vsub.f32 %v4374_v6, %v1204_v19 }
 0x122   : > { %v1208_v21 = vmul.f32 %v4387_v20, %v4387_v20 }
 0x124   : > { %1211 = vadd.xlane.f32.xlu1 %v1208_v21 }
 0x18f   : > { %v1210_v43 = vpop.xlane.xlu1 %1209 }
 0x190   : > { %v1213_v46 = vmul.f32 %v1210_v43, %v4377_v13 }
 0x192   : > { %v1215_v48 = vadd.f32 1e-06, %v1213_v46 }
 0x194   : > { %3400 = vrsqrt.f32 %v1215_v48  ;;  %vm1223_vm2 = vweird.f32 %v1215_v48 }
 0x197   : > { %v1212_v49 = vpop.xlane.xlu1 %1211 }
 0x198   : > { %v1214_v50 = vmul.f32 %v1212_v49, %v4377_v13 }
 0x19a   : > { %v3401_v51 = vpop.eup %3400  ;;  %v1216_v52 = vadd.f32 1e-06, %v1214_v50 }
 0x19b   : > { %v1218_v53 = vmul.f32 %v3401_v51, %v1215_v48  ;;  %vm1224_vm1 = vweird.f32 %v3401_v51 }
 0x19c   : > { %3402 = vrsqrt.f32 %v1216_v52  ;;  %vm1225_vm3 = vmor %vm1223_vm2, %vm1224_vm1  ;;  %vm1233_vm5 = vweird.f32 %v1216_v52 }
 0x19d   : > { %v1219_v54 = vmul.f32 %v3401_v51, %v1218_v53 }
 0x19f   : > { %v1220_v55 = vmul.f32 0.5, %v1219_v54 }
 0x1a1   : > { %v1221_v56 = vsub.f32 1.5, %v1220_v55 }
 0x1a2   : > { %v3403_v57 = vpop.eup %3402 }
 0x1a3   : > { %v1222_v58 = vmul.f32 %v3401_v51, %v1221_v56  ;;  %v1228_v59 = vmul.f32 %v3403_v57, %v1216_v52  ;;  %vm1234_vm4 = vweird.f32 %v3403_v57 }
 0x1a4   : > { %vm1235_vm6 = vmor %vm1233_vm5, %vm1234_vm4 }
 0x1a5   : > { %v1229_v60 = vmul.f32 %v3403_v57, %v1228_v59  ;;  %v1226_v61 = vsel %vm1225_vm3, %v3401_v51, %v1222_v58  ;;  %v1182_v58 = vld [vmem:[#allocation6] sm:$0x1] }
 0x1a6   : > { %v1237_v0 = vmul.f32 %v1226_v61, %v4381_v16  ;;  %vm1184_vm9 = vcmp.gt.f32.partialorder %v1182_v58, 0.5  ;;  %v3957_v61 = vmov -1e+30  }
 0x1a7   : > { %v1230_v62 = vmul.f32 0.5, %v1229_v60 }
 0x1a8   : > { %v1242_v7 = vmul.f32 %v3389_v1, %v1237_v0 }
 0x1a9   : > { %v1231_v63 = vsub.f32 1.5, %v1230_v62  ;;  %v1186_v62 = vsel %vm1184_vm9, 0.0, %v3957_v61 }
 0x1aa   : > { %v1247_v10 = vadd.f32 %v3390_v8, %v1242_v7 }
 0x1ab   : > { %v1232_v2 = vmul.f32 %v3403_v57, %v1231_v63 }
 0x1ad   : > { %v1236_v3 = vsel %vm1235_vm6, %v3403_v57, %v1232_v2 }
 0x1ae   : > { %v1238_v4 = vmul.f32 %v1236_v3, %v4387_v20  ;;  %v1506_v3 = vperm.slane %v1186_v62, 0 }
 0x1b0   : > { %v1243_v9 = vmul.f32 %v3389_v1, %v1238_v4 }
 0x1b2   : > { %v1248_v11 = vadd.f32 %v3390_v8, %v1243_v9 }
 0x1b4   : > { %v1249_v12 = vpack.c.bf16 %v1248_v11, %v1247_v10  ;;  %v1183_v11 = vld [vmem:[#allocation6 + $0x1] sm:$0x1] }
 0x1b5   : > { %vm1185_vm11 = vcmp.gt.f32.partialorder %v1183_v11, 0.5 }
 0x1b6   : > { %1326 = vmatmul.bf16.vlgmr.msra.gmra.mxu0 %v1249_v12  ;;  %1408 = vmatmul.bf16.vlgmr.msra.gmra.mxu1 %v1249_v12 }
 0x1b7   : > { %1490 = vmatmul.bf16.vlgmr.msra.gmra.mxu2 %v1249_v12 }
 0x233   : > { %v1327_v16 = vpop.f32.mrf.mxu0  ;;  %v1409_v17 = vpop.f32.mrf.mxu1 }
 0x234   : > { %v1328_v18 = vadd.f32 %v3391_v14, %v1327_v16  ;;  %v1410_v19 = vadd.f32 %v3392_v15, %v1409_v17 }
 0x236   : > { %v1496_v20 = vmul.f32 0.17677669, %v1328_v18  ;;  %v1500_v21 = vpack.c.bf16 %v1410_v19, %v1410_v19 }
 0x238   : > { %v1619_v23 = vunpack.c.l.b16 %v1500_v21  ;;  %v1515_v24 = vsel %vm1510_vm7, %v1500_v21, 0  ;;  %v1498_v25 = vpack.c.bf16 %v1496_v20, %v1496_v20 }
 0x239   : > { %1524 = vmatpush.bf16.xpose.msra.mxu3 %v1515_v24 }
 0x23a   : > { %v1620_v26 = vpack.c.b16 %v1619_v23, %v1619_v23  ;;  %v1491_v27 = vpop.f32.mrf.mxu2  ;;  %v1614_v34 = vunpack.c.l.b16 %v1498_v25 }
 0x23b   : > { %v1492_v28 = vadd.f32 %v3393_v22, %v1491_v27  ;;  %v1329_v29 = vpop.f32.mrf.mxu0  ;;  %v1411_v30 = vpop.f32.mrf.mxu1 }
 0x23c   : > { %v1330_v31 = vadd.f32 %v3391_v14, %v1329_v29  ;;  %v1412_v32 = vadd.f32 %v3392_v15, %v1411_v30  ;;  %1621 = vrot.lane.b32.xlu2 %v1620_v26, %s3954_s25  ;;  %v1615_v44 = vpack.c.b16 %v1614_v34, %v1614_v34  ;;  %v1187_v14 = vsel %vm1185_vm11, 0.0, %v3957_v61 }
 0x23d   : > { %v4437_v33 = vpack.c.bf16 %v1492_v28, %v1492_v28  ;;  %v1507_v15 = vperm.slane %v1187_v14, 0 }
 0x23e   : > { %v1497_v35 = vmul.f32 0.17677669, %v1330_v31  ;;  %v1501_v36 = vpack.c.bf16 %v1412_v32, %v1412_v32 }
 0x23f   : > { %v1579_v40 = vsel %vm1577_vm8, %v4437_v33, 0  ;;  %v1696_v28 = vunpack.c.l.b16 %v4437_v33 }
 0x240   : > { %v1499_v37 = vpack.c.bf16 %v1497_v35, %v1497_v35  ;;  %v1648_v38 = vunpack.c.l.b16 %v1501_v36  ;;  %2972 = vmatmul.msk.bf16.vlgmr.msra.gmra.mxu3 %vm1510_vm7, %v1498_v25  ;;  %v1534_v39 = vsel %vm1510_vm7, %v1501_v36, 0 }
 0x241   : > { %1543 = vmatpush.bf16.xpose.msrb.mxu3 %v1534_v39  ;;  %v4476_v31 = vpack.c.b16 %v1696_v28, %v1696_v28 }
 0x242   : > { %v1643_v41 = vunpack.c.l.b16 %v1499_v37  ;;  %v1649_v42 = vpack.c.b16 %v1648_v38, %v1648_v38  ;;  %v1493_v43 = vpop.f32.mrf.mxu2 }
 0x243   : > { %v1494_v45 = vadd.f32 %v3393_v22, %v1493_v43 }
 0x244   : > { %1650 = vrot.lane.b32.xlu0 %v1649_v42, %s3954_s25  ;;  %1616 = vrot.lane.b32.xlu2 %v1615_v44, %s3954_s25  ;;  %v1644_v46 = vpack.c.b16 %v1643_v41, %v1643_v41 }
 0x245   : > { %v4445_v47 = vpack.c.bf16 %v1494_v45, %v1494_v45 }
 0x246   : > { %1645 = vrot.lane.b32.xlu1 %v1644_v46, %s3954_s25 }
 0x247   : > { %v1598_v48 = vsel %vm1577_vm8, %v4445_v47, 0 }
 0x248   : > { %1607 = vmatpush.bf16.msrb.mxu0 %v1598_v48 }
 0x249   : > { %1588 = vmatpush.bf16.msra.mxu3 %v1579_v40 }
 0x24c   : > { %1766 = vrot.lane.b32.xlu0 %v1644_v46, %s3955_s18  ;;  %1745 = vrot.lane.b32.xlu2 %v1620_v26, %s3955_s18 }
 0x24e   : > { %1880 = vrot.lane.b32.xlu1 %v1649_v42, %s3956_s8 }
 0x250   : > { %2973 = vmatmul.msk.bf16.vlgmr.msrb.gmra.mxu3 %vm1510_vm7, %v1499_v37 }
 0x254   : > { %1855 = vrot.lane.b32.xlu0 %v1615_v44, %s3956_s8  ;;  %1768 = vrot.lane.b32.xlu2 %v1649_v42, %s3955_s18 }
 0x25c   : > { %1743 = vrot.lane.b32.xlu2 %v1615_v44, %s3955_s18 }
 0x264   : > { %1857 = vrot.lane.b32.xlu2 %v1620_v26, %s3956_s8 }
 0x26c   : > { %1878 = vrot.lane.b32.xlu2 %v1644_v46, %s3956_s8 }
 0x296   : > { %v1622_v49 = vpop.permute.xlu2 %1621 }
 0x297   : > { %v1627_v50 = vsel %vm1510_vm7, %v1622_v49, 0 }
 0x298   : > { %1636 = vmatpush.bf16.xpose.msrb.mxu2 %v1627_v50  ;;  %v1720_v50 = vunpack.c.l.b16 %v4445_v47 }
 0x29e   : > { %v1617_v51 = vpop.permute.xlu2 %1616 }
 0x29f   : > { %2976 = vmatmul.msk.bf16.vlgmr.msrb.gmra.mxu2 %vm1510_vm7, %v1617_v51 }
 0x2a6   : > { %v1746_v52 = vpop.permute.xlu2 %1745 }
 0x2a7   : > { %v1751_v53 = vsel %vm1510_vm7, %v1746_v52, 0  ;;  %v4485_v52 = vpack.c.b16 %v1720_v50, %v1720_v50 }
 0x2a8   : > { %1760 = vmatpush.bf16.xpose.msrb.mxu1 %v1751_v53 }
 0x2ae   : > { %v1769_v54 = vpop.permute.xlu2 %1768 }
 0x2af   : > { %v1774_v59 = vsel %vm1510_vm7, %v1769_v54, 0 }
 0x2b6   : > { %v1651_v55 = vpop.permute.xlu0 %1650  ;;  %v1744_v56 = vpop.permute.xlu2 %1743 }
 0x2b7   : > { %v1656_v57 = vsel %vm1510_vm7, %v1651_v55, 0  ;;  %2980 = vmatmul.msk.bf16.vlgmr.msrb.gmra.mxu1 %vm1510_vm7, %v1744_v56 }
 0x2b8   : > { %1665 = vmatpush.bf16.xpose.msra.mxu2 %v1656_v57  ;;  %v1646_v60 = vpop.permute.xlu1 %1645 }
 0x2be   : > { %v1767_v63 = vpop.permute.xlu0 %1766  ;;  %v1858_v0 = vpop.permute.xlu2 %1857 }
 0x2bf   : > { %v1863_v1 = vsel %vm1510_vm7, %v1858_v0, 0  ;;  %2977 = vmatmul.msk.bf16.vlgmr.msra.gmra.mxu2 %vm1510_vm7, %v1646_v60 }
 0x2c0   : > { %1783 = vmatpush.bf16.xpose.msrb.mxu2 %v1774_v59  ;;  %v1881_v2 = vpop.permute.xlu1 %1880  ;;  %1872 = vmatpush.bf16.xpose.msra.mxu1 %v1863_v1 }
 0x2c1   : > { %v1886_v4 = vsel %vm1510_vm7, %v1881_v2, 0 }
 0x2c3   : > { %v1526_v7 = vpop.f32.mrf.mxu3 }
 0x2c4   : > { %v1527_v8 = vadd.f32 %v1526_v7, %v1506_v3 }
 0x2c6   : > { %v1856_v9 = vpop.permute.xlu0 %1855  ;;  %v1550_v10 = vsel %vm1549_vm10, %v1527_v8, -inf  ;;  %v1879_v20 = vpop.permute.xlu2 %1878 }
 0x2c7   : > { %2984 = vmatmul.msk.bf16.vlgmr.msra.gmra.mxu1 %vm1510_vm7, %v1856_v9  ;;  %1551 = vmax.xlane.f32.xlu1 %v1550_v10 }
 0x2c8   : > { %1895 = vmatpush.bf16.xpose.msra.mxu2 %v1886_v4 }
 0x2cb   : > { %v1528_v12 = vpop.f32.mrf.mxu3 }
 0x2cf   : > { %2981 = vmatmul.msk.bf16.vlgmr.msrb.gmra.mxu2 %vm1510_vm7, %v1767_v63 }
 0x2d3   : > { %v1545_v16 = vpop.f32.mrf.mxu3 }
 0x2d4   : > { %v1546_v17 = vadd.f32 %v1545_v16, %v1507_v15 }
 0x2d6   : > { %v1553_v18 = vsel %vm1549_vm10, %v1546_v17, -inf }
 0x2d7   : > { %1554 = vmax.xlane.f32.xlu0 %v1553_v18 }
 0x2db   : > { %v1547_v19 = vpop.f32.mrf.mxu3 }
 0x2df   : > { %2985 = vmatmul.msk.bf16.vlgmr.msra.gmra.mxu2 %vm1510_vm7, %v1879_v20 }
 0x322   : > { %v1638_v21 = vpop.f32.mrf.mxu2 }
 0x323   : > { %v1639_v22 = vadd.f32 %v1638_v21, %v1506_v3 }
 0x325   : > { %v1671_v23 = vsel %vm1549_vm10, %v1639_v22, -inf }
 0x326   : > { %1672 = vmax.xlane.f32.xlu2 %v1671_v23 }
 0x32a   : > { %v1640_v24 = vpop.f32.mrf.mxu2 }
 0x334   : > { %v1762_v25 = vpop.f32.mrf.mxu1 }
 0x335   : > { %v1763_v26 = vadd.f32 %v1762_v25, %v1506_v3 }
 0x337   : > { %v1789_v27 = vsel %vm1549_vm10, %v1763_v26, -inf }
 0x338   : > { %1790 = vmax.xlane.f32.xlu0 %v1789_v27 }
 0x33a   : > { %v1552_v29 = vpop.xlane.xlu1 %1551 }
 0x33b   : > { %v1556_v30 = vsub.f32 %v1527_v8, %v1552_v29 }
 0x33c   : > { %v1764_v32 = vpop.f32.mrf.mxu1 }
 0x33d   : > { %v1558_v34 = vmul.f32 1.442695, %v1556_v30 }
 0x33e   : > { %1813 = vrot.lane.b32.xlu2 %v4476_v31, %s3955_s18 }
 0x33f   : > { %3404 = vpow2.f32 %v1558_v34 }
 0x342   : > { %v1667_v35 = vpop.f32.mrf.mxu2 }
 0x343   : > { %v1668_v36 = vadd.f32 %v1667_v35, %v1507_v15 }
 0x344   : > { %v1874_v37 = vpop.f32.mrf.mxu1 }
 0x345   : > { %v3405_v38 = vpop.eup %3404  ;;  %v1674_v39 = vsel %vm1549_vm10, %v1668_v36, -inf  ;;  %v1875_v40 = vadd.f32 %v1874_v37, %v1506_v3 }
 0x346   : > { %1675 = vmax.xlane.f32.xlu1 %v1674_v39  ;;  %v1562_v33 = vsel %vm1549_vm10, %v3405_v38, 0.0 }
 0x347   : > { %1563 = vadd.xlane.f32.xlu0 %v1562_v33  ;;  %v1901_v46 = vsel %vm1549_vm10, %v1875_v40, -inf }
 0x34a   : > { %v1669_v41 = vpop.f32.mrf.mxu2  ;;  %v1555_v42 = vpop.xlane.xlu0 %1554 }
 0x34b   : > { %v1557_v43 = vsub.f32 %v1546_v17, %v1555_v42 }
 0x34c   : > { %v1876_v44 = vpop.f32.mrf.mxu1 }
 0x34d   : > { %v1560_v45 = vmul.f32 1.442695, %v1557_v43 }
 0x34e   : > { %1902 = vmax.xlane.f32.xlu1 %v1901_v46 }
 0x34f   : > { %3406 = vpow2.f32 %v1560_v45 }
 0x352   : > { %v1785_v48 = vpop.f32.mrf.mxu2 }
 0x353   : > { %v1786_v54 = vadd.f32 %v1785_v48, %v1507_v15 }
 0x355   : > { %v3407_v49 = vpop.eup %3406  ;;  %v1792_v56 = vsel %vm1549_vm10, %v1786_v54, -inf }
 0x356   : > { %v1565_v51 = vsel %vm1549_vm10, %v3407_v49, 0.0 }
 0x357   : > { %1566 = vadd.xlane.f32.xlu1 %v1565_v51 }
 0x35a   : > { %v1787_v53 = vpop.f32.mrf.mxu2 }
 0x35b   : > { %1722 = vrot.lane.b32.xlu0 %v4485_v52, %s3954_s25 }
 0x362   : > { %v1897_v55 = vpop.f32.mrf.mxu2 }
 0x363   : > { %v1898_v57 = vadd.f32 %v1897_v55, %v1507_v15 }
 0x365   : > { %v1904_v59 = vsel %vm1549_vm10, %v1898_v57, -inf }
 0x367   : > { %1793 = vmax.xlane.f32.xlu2 %v1792_v56 }
 0x36a   : > { %v1899_v58 = vpop.f32.mrf.mxu2 }
 0x36f   : > { %1905 = vmax.xlane.f32.xlu2 %v1904_v59 }
 0x370   : > { %1698 = vrot.lane.b32.xlu1 %v4476_v31, %s3954_s25 }
 0x399   : > { %v1673_v47 = vpop.xlane.xlu2 %1672 }
 0x39a   : > { %v1677_v60 = vsub.f32 %v1639_v22, %v1673_v47 }
 0x39c   : > { %v1679_v61 = vmul.f32 1.442695, %v1677_v60 }
 0x39e   : > { %3408 = vpow2.f32 %v1679_v61 }
 0x3a4   : > { %v4493_v62 = vpop.eup %3408 }
 0x3a5   : > { %v1683_v63 = vsel %vm1549_vm10, %v4493_v62, 0.0 }
 0x3a6   : > { %1684 = vadd.xlane.f32.xlu0 %v1683_v63 }
 0x3ab   : > { %v1791_v0 = vpop.xlane.xlu0 %1790 }
 0x3ac   : > { %v1795_v1 = vsub.f32 %v1763_v26, %v1791_v0  ;;  %v1814_v26 = vpop.permute.xlu2 %1813 }
 0x3ae   : > { %v1797_v2 = vmul.f32 1.442695, %v1795_v1 }
 0x3b0   : > { %3410 = vpow2.f32 %v1797_v2 }
 0x3b6   : > { %v4497_v3 = vpop.eup %3410 }
 0x3b7   : > { %v1801_v4 = vsel %vm1549_vm10, %v4497_v3, 0.0 }
 0x3b8   : > { %1802 = vadd.xlane.f32.xlu2 %v1801_v4 }
 0x3b9   : > { %v1676_v7 = vpop.xlane.xlu1 %1675 }
 0x3ba   : > { %v1678_v8 = vsub.f32 %v1668_v36, %v1676_v7  ;;  %1834 = vrot.lane.b32.xlu0 %v4485_v52, %s3955_s18  ;;  %v1564_v9 = vpop.xlane.xlu0 %1563 }
 0x3bb   : > { %3412 = vrcp.f32 %v1564_v9 }
 0x3bc   : > { %v1681_v10 = vmul.f32 1.442695, %v1678_v8 }
 0x3be   : > { %3414 = vpow2.f32 %v1681_v10 }
 0x3c1   : > { %v3413_v11 = vpop.eup %3412  ;;  %v1903_v12 = vpop.xlane.xlu1 %1902 }
 0x3c2   : > { %v1570_v14 = vmul.f32 %v3413_v11, %v3405_v38  ;;  %v1907_v15 = vsub.f32 %v1875_v40, %v1903_v12  ;;  %v1819_v38 = vsel %vm1577_vm8, %v1814_v26, 0 }
 0x3c4   : > { %v3415_v16 = vpop.eup %3414  ;;  %v1572_v17 = vpack.c.bf16 %v1570_v14, %v1570_v14  ;;  %v1909_v18 = vmul.f32 1.442695, %v1907_v15 }
 0x3c5   : > { %v1686_v19 = vsel %vm1549_vm10, %v3415_v16, 0.0 }
 0x3c6   : > { %3416 = vpow2.f32 %v1909_v18  ;;  %2974 = vmatmul.msk.bf16.vlgmr.msra.gmra.mxu3 %vm1549_vm10, %v1572_v17  ;;  %1687 = vadd.xlane.f32.xlu2 %v1686_v19 }
 0x3ca   : > { %v1567_v20 = vpop.xlane.xlu1 %1566 }
 0x3cb   : > { %3418 = vrcp.f32 %v1567_v20 }
 0x3cc   : > { %v4505_v21 = vpop.eup %3416 }
 0x3cd   : > { %v1723_v22 = vpop.permute.xlu0 %1722  ;;  %v1913_v23 = vsel %vm1549_vm10, %v4505_v21, 0.0 }
 0x3ce   : > { %v1728_v24 = vsel %vm1577_vm8, %v1723_v22, 0  ;;  %1914 = vadd.xlane.f32.xlu1 %v1913_v23 }
 0x3cf   : > { %1737 = vmatpush.bf16.msra.mxu0 %v1728_v24 }
 0x3d1   : > { %v3419_v25 = vpop.eup %3418 }
 0x3d2   : > { %v1571_v27 = vmul.f32 %v3419_v25, %v3407_v49 }
 0x3d4   : > { %v1573_v28 = vpack.c.bf16 %v1571_v27, %v1571_v27 }
 0x3d6   : > { %2975 = vmatmul.msk.bf16.vlgmr.msrb.gmra.mxu0 %vm1549_vm10, %v1573_v28 }
 0x3da   : > { %v1794_v29 = vpop.xlane.xlu2 %1793 }
 0x3db   : > { %v1796_v30 = vsub.f32 %v1786_v54, %v1794_v29 }
 0x3dd   : > { %v1799_v32 = vmul.f32 1.442695, %v1796_v30  ;;  %v3190_v30 = vld [vmem:[%s4324_s0 + $0x38] sm:$0xff] }
 0x3de   : > { %2068 = vmatpush.bf16.msrb.mxu1 %v3190_v30  ;;  %v3046_v30 = vld [vmem:[%s4332_s2 + $0x30] sm:$0xf] }
 0x3df   : > { %3420 = vpow2.f32 %v1799_v32  ;;  %v3189_v32 = vld [vmem:[%s4324_s0 + $0x30] sm:$0xff] }
 0x3e2   : > { %v1906_v34 = vpop.xlane.xlu2 %1905  ;;  %v1699_v35 = vpop.permute.xlu1 %1698  ;;  %2069 = vmatpush.bf16.msrb.mxu1 %v3189_v32  ;;  %v3198_v32 = vld [vmem:[%s4332_s2 + $0x34] sm:$0xf0] }
 0x3e3   : > { %v1908_v36 = vsub.f32 %v1898_v57, %v1906_v34  ;;  %v1704_v37 = vsel %vm1577_vm8, %v1699_v35, 0  ;;  %v3188_v34 = vld [vmem:[%s4324_s0 + $0x28] sm:$0xff]  ;;  %v3187_v35 = vld [vmem:[%s4324_s0 + $0x20] sm:$0xff] }
 0x3e4   : > { %1713 = vmatpush.bf16.msrb.mxu3 %v1704_v37  ;;  %v3185_v37 = vld [vmem:[%s4324_s0 + $0x10] sm:$0xff] }
 0x3e5   : > { %v3421_v39 = vpop.eup %3420  ;;  %v1911_v33 = vmul.f32 1.442695, %v1908_v36  ;;  %v3186_v36 = vld [vmem:[%s4324_s0 + $0x18] sm:$0xff] }
 0x3e6   : > { %v1804_v40 = vsel %vm1549_vm10, %v3421_v39, 0.0  ;;  %2070 = vmatpush.bf16.msrb.mxu1 %v3188_v34  ;;  %v3197_v34 = vld [vmem:[%s4332_s2 + $0x34] sm:$0xf] }
 0x3e7   : > { %3422 = vpow2.f32 %v1911_v33  ;;  %1805 = vadd.xlane.f32.xlu2 %v1804_v40 }
 0x3e8   : > { %1828 = vmatpush.bf16.msra.mxu3 %v1819_v38  ;;  %v3184_v38 = vld [vmem:[%s4324_s0 + $0x8] sm:$0xff] }
 0x3ea   : > { %2071 = vmatpush.bf16.msrb.mxu1 %v3187_v35  ;;  %v3047_v35 = vor.u32 %v3198_v32, %v3046_v30  ;;  %v3210_v32 = vld [vmem:[%s4368_s23 + $0x18] sm:$0xff] }
 0x3ed   : > { %v3423_v41 = vpop.eup %3422 }
 0x3ee   : > { %v1916_v42 = vsel %vm1549_vm10, %v3423_v41, 0.0  ;;  %2072 = vmatpush.bf16.msrb.mxu1 %v3186_v36  ;;  %v3048_v36 = vld [vmem:[%s4332_s2 + $0x38] sm:$0xf0] }
 0x3ef   : > { %1917 = vadd.xlane.f32.xlu0 %v1916_v42 }
 0x3f2   : > { %2073 = vmatpush.bf16.msrb.mxu1 %v3185_v37  ;;  %v3051_v37 = vor.u32 %v3197_v34, %v3048_v36  ;;  %v3218_v34 = vld [vmem:[%s4368_s23 + $0x58] sm:$0xff]  ;;  %v3208_v36 = vld [vmem:[%s4368_s23 + $0x8] sm:$0xff] }
 0x3f6   : > { %2074 = vmatpush.bf16.msrb.mxu1 %v3184_v38  ;;  %v3038_v38 = vld [vmem:[%s4332_s2 + $0x20] sm:$0xf] }
 0x3ff   : > { %1925 = vrot.lane.b32.xlu2 %v4476_v31, %s3956_s8 }
 0x407   : > { %1946 = vrot.lane.b32.xlu2 %v4485_v52, %s3956_s8 }
 0x419   : > { %v1685_v43 = vpop.xlane.xlu0 %1684 }
 0x41a   : > { %3424 = vrcp.f32 %v1685_v43 }
 0x420   : > { %v3425_v44 = vpop.eup %3424 }
 0x421   : > { %v1691_v45 = vmul.f32 %v3425_v44, %v4493_v62 }
 0x423   : > { %v1693_v46 = vpack.c.bf16 %v1691_v45, %v1691_v45 }
 0x425   : > { %2978 = vmatmul.msk.bf16.vlgmr.msrb.gmra.mxu3 %vm1549_vm10, %v1693_v46 }
 0x42b   : > { %v1803_v48 = vpop.xlane.xlu2 %1802 }
 0x42c   : > { %3426 = vrcp.f32 %v1803_v48  ;;  %v1835_v49 = vpop.permute.xlu0 %1834 }
 0x42d   : > { %v1840_v50 = vsel %vm1577_vm8, %v1835_v49, 0 }
 0x42e   : > { %1849 = vmatpush.bf16.msrb.mxu0 %v1840_v50 }
 0x432   : > { %v3427_v51 = vpop.eup %3426 }
 0x433   : > { %v1809_v31 = vmul.f32 %v3427_v51, %v4497_v3 }
 0x435   : > { %v1811_v53 = vpack.c.bf16 %v1809_v31, %v1809_v31 }
 0x437   : > { %2982 = vmatmul.msk.bf16.vlgmr.msra.gmra.mxu3 %vm1549_vm10, %v1811_v53 }
 0x439   : > { %v1688_v52 = vpop.xlane.xlu2 %1687 }
 0x43a   : > { %3428 = vrcp.f32 %v1688_v52 }
 0x440   : > { %v3429_v54 = vpop.eup %3428 }
 0x441   : > { %v1692_v55 = vmul.f32 %v3429_v54, %v3415_v16  ;;  %v1915_v47 = vpop.xlane.xlu1 %1914 }
 0x442   : > { %3430 = vrcp.f32 %v1915_v47 }
 0x443   : > { %v1694_v56 = vpack.c.bf16 %v1692_v55, %v1692_v55  ;;  %v3394_v55 = vld [vmem:[%s1158_s12] ss:$0 sm:$0xff] }
 0x445   : > { %2979 = vmatmul.msk.bf16.vlgmr.msra.gmra.mxu0 %vm1549_vm10, %v1694_v56 }
 0x448   : > { %v3431_v62 = vpop.eup %3430 }
 0x449   : > { %v4525_v57 = vpop.f32.mrf.mxu3  ;;  %v1921_v0 = vmul.f32 %v3431_v62, %v4505_v21 }
 0x44b   : > { %v1923_v8 = vpack.c.bf16 %v1921_v0, %v1921_v0 }
 0x451   : > { %v1592_v58 = vpop.f32.mrf.mxu3 }
 0x453   : > { %v4527_v59 = vpop.f32.mrf.mxu0 }
 0x45a   : > { %v1806_v60 = vpop.xlane.xlu2 %1805 }
 0x45b   : > { %3432 = vrcp.f32 %v1806_v60  ;;  %v1611_v61 = vpop.f32.mrf.mxu0 }
 0x461   : > { %v3433_v63 = vpop.eup %3432 }
 0x462   : > { %v1810_v1 = vmul.f32 %v3433_v63, %v3421_v39  ;;  %v1926_v2 = vpop.permute.xlu2 %1925  ;;  %v1918_v7 = vpop.xlane.xlu0 %1917  ;;  %v3183_v39 = vld [vmem:[%s4324_s0] sm:$0xff] }
 0x463   : > { %v1931_v3 = vsel %vm1577_vm8, %v1926_v2, 0  ;;  %3434 = vrcp.f32 %v1918_v7  ;;  %2075 = vmatpush.bf16.msrb.mxu1 %v3183_v39  ;;  %v3205_v7 = vld [vmem:[%s4332_s2 + $0x74] sm:$0xf]  ;;  %v3196_v39 = vld [vmem:[%s4332_s2 + $0x24] sm:$0xf0] }
 0x464   : > { %v1812_v4 = vpack.c.bf16 %v1810_v1, %v1810_v1  ;;  %1940 = vmatpush.bf16.msrb.mxu3 %v1931_v3  ;;  %v3078_v3 = vld [vmem:[%s4332_s2 + $0x70] sm:$0xf] }
 0x466   : > { %2983 = vmatmul.msk.bf16.vlgmr.msrb.gmra.mxu0 %vm1549_vm10, %v1812_v4  ;;  %v3206_v4 = vld [vmem:[%s4332_s2 + $0x74] sm:$0xf0] }
 0x467   : > { %2986 = vmatmul.msk.bf16.vlgmr.msrb.gmra.mxu3 %vm1549_vm10, %v1923_v8  ;;  %v3079_v8 = vor.u32 %v3206_v4, %v3078_v3  ;;  %v3212_v4 = vld [vmem:[%s4368_s23 + $0x28] sm:$0xff] }
 0x469   : > { %v3435_v11 = vpop.eup %3434  ;;  %2239 = vmatpush.bf16.msrb.mxu2 %v3079_v8 }
 0x46a   : > { %v1947_v9 = vpop.permute.xlu2 %1946  ;;  %v1922_v12 = vmul.f32 %v3435_v11, %v3423_v41  ;;  %v3070_v11 = vld [vmem:[%s4332_s2 + $0x60] sm:$0xf] }
 0x46b   : > { %v1952_v10 = vsel %vm1577_vm8, %v1947_v9, 0  ;;  %v3080_v9 = vld [vmem:[%s4332_s2 + $0x78] sm:$0xf0] }
 0x46c   : > { %1961 = vmatpush.bf16.msra.mxu0 %v1952_v10  ;;  %v1924_v14 = vpack.c.bf16 %v1922_v12, %v1922_v12  ;;  %v3083_v10 = vor.u32 %v3205_v7, %v3080_v9  ;;  %v3204_v12 = vld [vmem:[%s4332_s2 + $0x64] sm:$0xf0] }
 0x46d   : > { %v3220_v7 = vld [vmem:[%s4368_s23 + $0x68] sm:$0xff] }
 0x46e   : > { %2253 = vmatpush.bf16.msra.mxu3 %v3083_v10  ;;  %v3211_v10 = vld [vmem:[%s4368_s23 + $0x20] sm:$0xff] }
 0x476   : > { %2987 = vmatmul.msk.bf16.vlgmr.msra.gmra.mxu0 %vm1549_vm10, %v1924_v14  ;;  %v3203_v14 = vld [vmem:[%s4332_s2 + $0x64] sm:$0xf] }
 0x4a8   : > { %v1715_v15 = vpop.f32.mrf.mxu3 }
 0x4b0   : > { %v1717_v16 = vpop.f32.mrf.mxu3 }
 0x4b1   : > { %v3072_v16 = vld [vmem:[%s4332_s2 + $0x68] sm:$0xf0] }
 0x4ba   : > { %v1830_v17 = vpop.f32.mrf.mxu3 }
 0x4c2   : > { %v1739_v18 = vpop.f32.mrf.mxu0  ;;  %v1832_v19 = vpop.f32.mrf.mxu3 }
 0x4c3   : > { %v3374_v20 = vpack.i.bf16 %v1739_v18, %v1715_v15  ;;  %v3071_v15 = vor.u32 %v3204_v12, %v3070_v11  ;;  %v3062_v18 = vld [vmem:[%s4332_s2 + $0x50] sm:$0xf]  ;;  %v3202_v19 = vld [vmem:[%s4332_s2 + $0x54] sm:$0xf0]  ;;  %v3219_v11 = vld [vmem:[%s4368_s23 + $0x60] sm:$0xff] }
 0x4c5   : > { %3375 = vrot.lane.b32.xlu2 %v3374_v20, %s3956_s8  ;;  %2240 = vmatpush.bf16.msrb.mxu2 %v3071_v15  ;;  %v3201_v20 = vld [vmem:[%s4332_s2 + $0x54] sm:$0xf] }
 0x4ca   : > { %v1741_v21 = vpop.f32.mrf.mxu0 }
 0x4cb   : > { %v3063_v21 = vor.u32 %v3202_v19, %v3062_v18 }
 0x4cd   : > { %2241 = vmatpush.bf16.msrb.mxu2 %v3063_v21 }
 0x4e3   : > { %v1851_v22 = vpop.f32.mrf.mxu0 }
 0x4e4   : > { %v3379_v23 = vpack.i.bf16 %v1851_v22, %v1830_v17  ;;  %v3075_v17 = vor.u32 %v3203_v14, %v3072_v16  ;;  %v3064_v22 = vld [vmem:[%s4332_s2 + $0x58] sm:$0xf0] }
 0x4e6   : > { %3380 = vrot.lane.b32.xlu1 %v3379_v23, %s3955_s18  ;;  %2254 = vmatpush.bf16.msra.mxu3 %v3075_v17  ;;  %v3067_v23 = vor.u32 %v3201_v20, %v3064_v22  ;;  %v3395_v22 = vld [vmem:[%s1161_s7] ss:$0 sm:$0xff] }
 0x4ea   : > { %v1942_v24 = vpop.f32.mrf.mxu3  ;;  %2255 = vmatpush.bf16.msra.mxu3 %v3067_v23 }
 0x4eb   : > { %v1853_v25 = vpop.f32.mrf.mxu0 }
 0x4ec   : > { %v3200_v25 = vld [vmem:[%s4332_s2 + $0x44] sm:$0xf0] }
 0x4f2   : > { %v1944_v26 = vpop.f32.mrf.mxu3 }
 0x4f3   : > { %v1963_v27 = vpop.f32.mrf.mxu0  ;;  %v3199_v26 = vld [vmem:[%s4332_s2 + $0x44] sm:$0xf] }
 0x4f4   : > { %v3384_v28 = vpack.i.bf16 %v1963_v27, %v1942_v24  ;;  %v3054_v24 = vld [vmem:[%s4332_s2 + $0x40] sm:$0xf] }
 0x4f5   : > { %v3055_v27 = vor.u32 %v3200_v25, %v3054_v24 }
 0x4f6   : > { %3385 = vrot.lane.b32.xlu2 %v3384_v28, %s3954_s25  ;;  %v3056_v28 = vld [vmem:[%s4332_s2 + $0x48] sm:$0xf0] }
 0x4f7   : > { %2242 = vmatpush.bf16.msrb.mxu2 %v3055_v27  ;;  %v3396_v27 = vld [vmem:[%s4786_s13] ss:$0 sm:$0xff] }
 0x4fb   : > { %v1965_v29 = vpop.f32.mrf.mxu0  ;;  %2243 = vmatpush.bf16.msrb.mxu2 %v3047_v35  ;;  %v3209_v35 = vld [vmem:[%s4368_s23 + $0x10] sm:$0xff] }
 0x4fc   : > { %v3059_v29 = vor.u32 %v3199_v26, %v3056_v28 }
 0x4fe   : > { %2256 = vmatpush.bf16.msra.mxu3 %v3059_v29 }
 0x502   : > { %2257 = vmatpush.bf16.msra.mxu3 %v3051_v37  ;;  %v3216_v37 = vld [vmem:[%s4368_s23 + $0x48] sm:$0xff] }
 0x51f   : > { %v3376_v33 = vpop.permute.xlu2 %3375 }
 0x520   : > { %v3378_v40 = vunpack.i.h.bf16 %v3376_v33  ;;  %v3377_v41 = vunpack.i.l.bf16 %v3376_v33  ;;  %v3195_v33 = vld [vmem:[%s4332_s2 + $0x24] sm:$0xf] }
 0x522   : > { %v1992_v46 = vsel %vm1510_vm7, %v4527_v59, %v3378_v40  ;;  %v1991_v48 = vsel %vm1510_vm7, %v4525_v57, %v3377_v41  ;;  %v3039_v40 = vor.u32 %v3196_v39, %v3038_v38  ;;  %v3040_v41 = vld [vmem:[%s4332_s2 + $0x28] sm:$0xf0]  ;;  %v3207_v38 = vld [vmem:[%s4368_s23] sm:$0xff] }
 0x523   : > { %v3215_v39 = vld [vmem:[%s4368_s23 + $0x40] sm:$0xff] }
 0x524   : > { %2244 = vmatpush.bf16.msrb.mxu2 %v3039_v40 }
 0x550   : > { %v3386_v42 = vpop.permute.xlu2 %3385 }
 0x551   : > { %v3388_v49 = vunpack.i.h.bf16 %v3386_v42  ;;  %v3387_v50 = vunpack.i.l.bf16 %v3386_v42  ;;  %v3043_v42 = vor.u32 %v3195_v33, %v3040_v41  ;;  %v2153_v33 = vld [vmem:[%s4366_s19] sm:$0x3] }
 0x553   : > { %2258 = vmatpush.bf16.msra.mxu3 %v3043_v42  ;;  %v2155_v42 = vperm.slane %v2153_v33, 0 }
 0x558   : > { %v3381_v43 = vpop.permute.xlu1 %3380 }
 0x559   : > { %v3383_v44 = vunpack.i.h.bf16 %v3381_v43  ;;  %v3382_v45 = vunpack.i.l.bf16 %v3381_v43  ;;  %v3030_v43 = vld [vmem:[%s4332_s2 + $0x10] sm:$0xf] }
 0x55b   : > { %v1995_v51 = vsel %vm1993_vm12, %v1992_v46, %v3383_v44  ;;  %v1994_v31 = vsel %vm1993_vm12, %v1991_v48, %v3382_v45  ;;  %v3194_v44 = vld [vmem:[%s4332_s2 + $0x14] sm:$0xf0]  ;;  %v3193_v45 = vld [vmem:[%s4332_s2 + $0x14] sm:$0xf]  ;;  %v3032_v48 = vld [vmem:[%s4332_s2 + $0x18] sm:$0xf0] }
 0x55c   : > { %v1998_v53 = vsel %vm1996_vm13, %v1995_v51, %v3388_v49  ;;  %v1997_v52 = vsel %vm1996_vm13, %v1994_v31, %v3387_v50  ;;  %v3031_v46 = vor.u32 %v3194_v44, %v3030_v43  ;;  %v3022_v49 = vld [vmem:[%s4332_s2] sm:$0xf]  ;;  %v3192_v50 = vld [vmem:[%s4332_s2 + $0x4] sm:$0xf0]  ;;  %v3035_v31 = vor.u32 %v3193_v45, %v3032_v48 }
 0x55d   : > { %v1999_v54 = vpack.c.bf16 %v1998_v53, %v1997_v52  ;;  %v3191_v53 = vld [vmem:[%s4332_s2 + $0x4] sm:$0xf]  ;;  %v3024_v52 = vld [vmem:[%s4332_s2 + $0x8] sm:$0xf0]  ;;  %v2156_v43 = vperm.slane %v2153_v33, 1 }
 0x55e   : > { %2245 = vmatpush.bf16.msrb.mxu2 %v3031_v46  ;;  %2259 = vmatpush.bf16.msra.mxu3 %v3035_v31 }
 0x55f   : > { %2076 = vmatmul.bf16.vlgmr.msrb.gmra.mxu1 %v1999_v54 }
 0x5dc   : > { %v2077_v56 = vpop.f32.mrf.mxu1 }
 0x5dd   : > { %v2078_v58 = vadd.f32 %v3394_v55, %v2077_v56  ;;  %v3027_v56 = vor.u32 %v3191_v53, %v3024_v52 }
 0x5df   : > { %v4556_v59 = vadd.f32 %v2078_v58, %v4371_v5  ;;  %2260 = vmatpush.bf16.msra.mxu3 %v3027_v56  ;;  %v3397_v56 = vld [vmem:[%s1168_s15] ss:$0 sm:$0xff] }
 0x5e1   : > { %2086 = vadd.xlane.f32.xlu0 %v4556_v59 }
 0x5e4   : > { %v2079_v57 = vpop.f32.mrf.mxu1 }
 0x5e5   : > { %v2080_v47 = vadd.f32 %v3394_v55, %v2079_v57  ;;  %v3023_v55 = vor.u32 %v3192_v50, %v3022_v49  ;;  %v3214_v57 = vld [vmem:[%s4368_s23 + $0x38] sm:$0xff] }
 0x5e6   : > { %2405 = vmatpush.bf16.msrb.mxu0 %v3214_v57 }
 0x5e7   : > { %v4560_v60 = vadd.f32 %v2080_v47, %v4374_v6  ;;  %2246 = vmatpush.bf16.msrb.mxu2 %v3023_v55  ;;  %v3222_v47 = vld [vmem:[%s4368_s23 + $0x78] sm:$0xff] }
 0x5e8   : > { %2419 = vmatpush.bf16.msra.mxu1 %v3222_v47 }
 0x5e9   : > { %2088 = vadd.xlane.f32.xlu2 %v4560_v60 }
 0x654   : > { %v2087_v61 = vpop.xlane.xlu0 %2086 }
 0x655   : > { %v2090_v62 = vmul.f32 %v2087_v61, %v4377_v13 }
 0x657   : > { %v4565_v63 = vsub.f32 %v4556_v59, %v2090_v62 }
 0x659   : > { %v2094_v5 = vmul.f32 %v4565_v63, %v4565_v63 }
 0x65b   : > { %2096 = vadd.xlane.f32.xlu0 %v2094_v5  ;;  %v3213_v5 = vld [vmem:[%s4368_s23 + $0x30] sm:$0xff] }
 0x65c   : > { %v2089_v0 = vpop.xlane.xlu2 %2088  ;;  %2406 = vmatpush.bf16.msrb.mxu0 %v3213_v5 }
 0x65d   : > { %v2091_v6 = vmul.f32 %v2089_v0, %v4377_v13  ;;  %v3221_v0 = vld [vmem:[%s4368_s23 + $0x70] sm:$0xff] }
 0x65e   : > { %2420 = vmatpush.bf16.msra.mxu1 %v3221_v0 }
 0x65f   : > { %v4571_v1 = vsub.f32 %v4560_v60, %v2091_v6 }
 0x660   : > { %2407 = vmatpush.bf16.msrb.mxu0 %v3212_v4 }
 0x661   : > { %v2095_v2 = vmul.f32 %v4571_v1, %v4571_v1 }
 0x662   : > { %2421 = vmatpush.bf16.msra.mxu1 %v3220_v7 }
 0x663   : > { %2098 = vadd.xlane.f32.xlu0 %v2095_v2 }
 0x664   : > { %2408 = vmatpush.bf16.msrb.mxu0 %v3211_v10 }
 0x666   : > { %2422 = vmatpush.bf16.msra.mxu1 %v3219_v11 }
 0x668   : > { %2409 = vmatpush.bf16.msrb.mxu0 %v3210_v32 }
 0x66a   : > { %2423 = vmatpush.bf16.msra.mxu1 %v3218_v34 }
 0x66c   : > { %2410 = vmatpush.bf16.msrb.mxu0 %v3209_v35 }
 0x670   : > { %2411 = vmatpush.bf16.msrb.mxu0 %v3208_v36 }
 0x674   : > { %2412 = vmatpush.bf16.msrb.mxu0 %v3207_v38 }
 0x6ce   : > { %v2097_v51 = vpop.xlane.xlu0 %2096 }
 0x6cf   : > { %v2100_v54 = vmul.f32 %v2097_v51, %v4377_v13 }
 0x6d1   : > { %v2102_v58 = vadd.f32 1e-06, %v2100_v54 }
 0x6d3   : > { %3436 = vrsqrt.f32 %v2102_v58  ;;  %vm2110_vm15 = vweird.f32 %v2102_v58 }
 0x6d6   : > { %v2099_v61 = vpop.xlane.xlu0 %2098 }
 0x6d7   : > { %v2101_v62 = vmul.f32 %v2099_v61, %v4377_v13 }
 0x6d9   : > { %v3437_v6 = vpop.eup %3436  ;;  %v2103_v2 = vadd.f32 1e-06, %v2101_v62 }
 0x6da   : > { %v2105_v3 = vmul.f32 %v3437_v6, %v2102_v58  ;;  %vm2111_vm14 = vweird.f32 %v3437_v6 }
 0x6db   : > { %3438 = vrsqrt.f32 %v2103_v2  ;;  %vm2112_vm0 = vmor %vm2110_vm15, %vm2111_vm14  ;;  %vm2120_vm2 = vweird.f32 %v2103_v2 }
 0x6dc   : > { %v2106_v8 = vmul.f32 %v3437_v6, %v2105_v3 }
 0x6de   : > { %v2107_v9 = vmul.f32 0.5, %v2106_v8 }
 0x6e0   : > { %v2108_v12 = vsub.f32 1.5, %v2107_v9 }
 0x6e1   : > { %v3439_v14 = vpop.eup %3438 }
 0x6e2   : > { %v2109_v15 = vmul.f32 %v3437_v6, %v2108_v12  ;;  %v2115_v16 = vmul.f32 %v3439_v14, %v2103_v2  ;;  %vm2121_vm1 = vweird.f32 %v3439_v14 }
 0x6e3   : > { %vm2122_vm3 = vmor %vm2120_vm2, %vm2121_vm1 }
 0x6e4   : > { %v2116_v17 = vmul.f32 %v3439_v14, %v2115_v16  ;;  %v2113_v18 = vsel %vm2112_vm0, %v3437_v6, %v2109_v15 }
 0x6e5   : > { %v2124_v21 = vmul.f32 %v2113_v18, %v4565_v63 }
 0x6e6   : > { %v2117_v19 = vmul.f32 0.5, %v2116_v17 }
 0x6e7   : > { %v2129_v26 = vmul.f32 %v3395_v22, %v2124_v21 }
 0x6e8   : > { %v2118_v20 = vsub.f32 1.5, %v2117_v19 }
 0x6e9   : > { %v2134_v28 = vadd.f32 %v3396_v27, %v2129_v26 }
 0x6ea   : > { %v2119_v23 = vmul.f32 %v3439_v14, %v2118_v20 }
 0x6ec   : > { %v2123_v24 = vsel %vm2122_vm3, %v3439_v14, %v2119_v23 }
 0x6ed   : > { %v2125_v25 = vmul.f32 %v2123_v24, %v4571_v1  ;;  %v3217_v1 = vld [vmem:[%s4368_s23 + $0x50] sm:$0xff]  ;;  %s4790_s23 = sld [smem:[#allocation61_spill]] (!%p3148_p3) }
 0x6ee   : > { %2424 = vmatpush.bf16.msra.mxu1 %v3217_v1 }
 0x6ef   : > { %v2130_v63 = vmul.f32 %v3395_v22, %v2125_v25 }
 0x6f1   : > { %v2135_v29 = vadd.f32 %v3396_v27, %v2130_v63 }
 0x6f2   : > { %2425 = vmatpush.bf16.msra.mxu1 %v3216_v37 }
 0x6f3   : > { %v2136_v30 = vpack.c.bf16 %v2135_v29, %v2134_v28 }
 0x6f5   : > { %2247 = vmatmul.bf16.vlgmr.msrb.gmra.mxu2 %v2136_v30  ;;  %2261 = vmatmul.bf16.vlgmr.msra.gmra.mxu3 %v2136_v30 }
 0x6f6   : > { %2426 = vmatpush.bf16.msra.mxu1 %v3215_v39 }
 0x778   : > { %v2248_v40 = vpop.f32.mrf.mxu2  ;;  %v2262_v41 = vpop.f32.mrf.mxu3 }
 0x779   : > { %v2249_v44 = vadd.f32 %v2248_v40, %v2155_v42  ;;  %v2263_v45 = vadd.f32 %v2262_v41, %v2156_v43 }
 0x77b   : > { %v2267_v51 = vmax.f32 %v2249_v44, 0.0  ;;  %v2268_v31 = vmax.f32 %v2263_v45, 0.0 }
 0x780   : > { %v2250_v46 = vpop.f32.mrf.mxu2  ;;  %v2264_v48 = vpop.f32.mrf.mxu3 }
 0x781   : > { %v2251_v49 = vadd.f32 %v2250_v46, %v2155_v42  ;;  %v2265_v50 = vadd.f32 %v2264_v48, %v2156_v43 }
 0x783   : > { %v2269_v53 = vmax.f32 %v2251_v49, 0.0  ;;  %v2270_v52 = vmax.f32 %v2265_v50, 0.0 }
 0x785   : > { %v2271_v54 = vpack.c.bf16 %v2269_v53, %v2267_v51  ;;  %v2272_v55 = vpack.c.bf16 %v2270_v52, %v2268_v31 }
 0x787   : > { %2413 = vmatmul.bf16.vlgmr.msrb.gmra.mxu0 %v2271_v54  ;;  %2427 = vmatmul.bf16.vlgmr.msra.gmra.mxu1 %v2272_v55 }
 0x804   : > { %v2414_v58 = vpop.f32.mrf.mxu0  ;;  %v2428_v57 = vpop.f32.mrf.mxu1 }
 0x805   : > { %v2415_v47 = vadd.f32 %v3397_v56, %v2414_v58 }
 0x807   : > { %v2429_v61 = vadd.f32 %v2428_v57, %v2415_v47 }
 0x809   : > { %v2433_v62 = vadd.f32 %v2429_v61, %v4556_v59 }
 0x80b   : > { %2435 = vst [vmem:[#allocation2] sm:$0xff] %v2433_v62 }
 0x80c   : > { %v2416_v5 = vpop.f32.mrf.mxu0  ;;  %v2430_v6 = vpop.f32.mrf.mxu1 }
 0x80d   : > { %v2417_v0 = vadd.f32 %v3397_v56, %v2416_v5 }
 0x80f   : > { %v2431_v2 = vadd.f32 %v2430_v6, %v2417_v0  ;;  %2440 = sbr.rel (%p3148_p3) target bundleno = 2344 (0x928), region = 164 }
 0x811   : > { %v2434_v3 = vadd.f32 %v2431_v2, %v4560_v60 }
 0x813   : > { %2436 = vst [vmem:[#allocation2 + $0x8] sm:$0xff] %v2434_v3 }
 0x814   : > { %v2441_v4 = vld [vmem:[#allocation2] sm:$0xff] }
 0x815   : > { %2445 = vadd.xlane.f32.xlu0 %v2441_v4  ;;  %v3440_v28 = vld [vmem:[%s4789_s28] ss:$0 sm:$0xff] }
 0x81a   : > { %v2442_v7 = vld [vmem:[#allocation2 + $0x8] sm:$0xff] }
 0x81d   : > { %2447 = vadd.xlane.f32.xlu0 %v2442_v7 }
 0x888   : > { %v2446_v8 = vpop.xlane.xlu0 %2445 }
 0x889   : > { %v2449_v9 = vmul.f32 %v2446_v8, %v4377_v13 }
 0x88b   : > { %v2451_v10 = vsub.f32 %v2441_v4, %v2449_v9 }
 0x88d   : > { %v2453_v59 = vmul.f32 %v2451_v10, %v2451_v10 }
 0x88f   : > { %2455 = vadd.xlane.f32.xlu1 %v2453_v59 }
 0x890   : > { %v2448_v11 = vpop.xlane.xlu0 %2447 }
 0x891   : > { %v2450_v12 = vmul.f32 %v2448_v11, %v4377_v13 }
 0x893   : > { %v2452_v14 = vsub.f32 %v2442_v7, %v2450_v12 }
 0x895   : > { %v2454_v15 = vmul.f32 %v2452_v14, %v2452_v14 }
 0x897   : > { %2457 = vadd.xlane.f32.xlu1 %v2454_v15 }
 0x902   : > { %v2456_v60 = vpop.xlane.xlu1 %2455 }
 0x903   : > { %v2459_v16 = vmul.f32 %v2456_v60, %v4377_v13 }
 0x905   : > { %v2461_v17 = vadd.f32 1e-06, %v2459_v16 }
 0x907   : > { %3442 = vrsqrt.f32 %v2461_v17  ;;  %vm2469_vm5 = vweird.f32 %v2461_v17 }
 0x90a   : > { %v2458_v18 = vpop.xlane.xlu1 %2457 }
 0x90b   : > { %v2460_v19 = vmul.f32 %v2458_v18, %v4377_v13  ;;  %v3441_v13 = vld [vmem:[%s4790_s23] ss:$0 sm:$0xff] }
 0x90d   : > { %v3443_v20 = vpop.eup %3442  ;;  %v2462_v21 = vadd.f32 1e-06, %v2460_v19 }
 0x90e   : > { %v2464_v22 = vmul.f32 %v3443_v20, %v2461_v17  ;;  %vm2470_vm4 = vweird.f32 %v3443_v20 }
 0x90f   : > { %3444 = vrsqrt.f32 %v2462_v21  ;;  %vm2471_vm6 = vmor %vm2469_vm5, %vm2470_vm4  ;;  %vm2479_vm8 = vweird.f32 %v2462_v21 }
 0x910   : > { %v2465_v23 = vmul.f32 %v3443_v20, %v2464_v22 }
 0x912   : > { %v2466_v24 = vmul.f32 0.5, %v2465_v23 }
 0x914   : > { %v2467_v25 = vsub.f32 1.5, %v2466_v24 }
 0x915   : > { %v3445_v26 = vpop.eup %3444 }
 0x916   : > { %v2468_v27 = vmul.f32 %v3443_v20, %v2467_v25  ;;  %v2474_v63 = vmul.f32 %v3445_v26, %v2462_v21  ;;  %vm2480_vm7 = vweird.f32 %v3445_v26 }
 0x917   : > { %vm2481_vm9 = vmor %vm2479_vm8, %vm2480_vm7 }
 0x918   : > { %v2472_v29 = vsel %vm2471_vm6, %v3443_v20, %v2468_v27  ;;  %v2475_v30 = vmul.f32 %v3445_v26, %v2474_v63 }
 0x919   : > { %v2483_v32 = vmul.f32 %v2472_v29, %v2451_v10 }
 0x91a   : > { %v2476_v34 = vmul.f32 0.5, %v2475_v30 }
 0x91b   : > { %v2488_v35 = vmul.f32 %v3440_v28, %v2483_v32 }
 0x91c   : > { %v2477_v1 = vsub.f32 1.5, %v2476_v34 }
 0x91d   : > { %v2493_v36 = vadd.f32 %v3441_v13, %v2488_v35 }
 0x91e   : > { %v2478_v37 = vmul.f32 %v3445_v26, %v2477_v1 }
 0x91f   : > { %2495 = vst [vmem:[#allocation24] sm:$0xff] %v2493_v36 }
 0x920   : > { %v2482_v38 = vsel %vm2481_vm9, %v3445_v26, %v2478_v37 }
 0x921   : > { %v2484_v39 = vmul.f32 %v2482_v38, %v2452_v14 }
 0x923   : > { %v2489_v33 = vmul.f32 %v3440_v28, %v2484_v39 }
 0x925   : > { %v2494_v40 = vadd.f32 %v3441_v13, %v2489_v33 }
 0x927   : > { %2496 = vst [vmem:[#allocation24 + $0x8] sm:$0xff] %v2494_v40 }
 0x928 PF: > { %p3307_p4 = scmp.eq.s32.totalorder %s4100_s29, 1  ;;  %s4791_s17 = sld [smem:[#allocation62_spill]] }
 0x929   : > { %s3958_s1 = smov [#allocation24]   ;;  %s3959_s6 = smov 128  }
 0x92a   : > { %s2505_s27 = sshll.u32 %s3958_s1, 4  ;;  %s3960_s24 = smov 8   ;;  %s2506_s27 = int_to_ptr.vmem [resolvable:$true] %s2505_s27 }
 0x92e   : > { %s2507_s3 = sshll.u32 %s4791_s17, 4  ;;  %s2508_s3 = int_to_ptr.hbm [resolvable:$true] %s2507_s3 }
 0x92f   : > { %3256 = dma.vmem_to_hbm [thread:$0]  (%p3307_p4), %s2506_s27, 256, %s2508_s3, [#allocation5], %s3959_s6, %s3959_s6, %s3960_s24  }
 0x930   : > { %3917 = dma.done.wait (%p3307_p4), [#allocation5], 256  }
 0x931   : > { %3919 = vsyncadd (%p3307_p4), [#allocation5], 4294967040 }
 0x932 PF: > { %s4792_s11 = sld [smem:[#allocation37_spill]] }
 0x933   : > { %s4793_s2 = sld [smem:[#allocation33_spill]] }
 0x934   : > { %s4794_s25 = sld [smem:[#allocation34_spill]] }
 0x935   : > { %s4795_s26 = sld [smem:[#allocation40_spill]] }
 0x936   : > { %s4796_s27 = sld [smem:[#allocation36_spill]] }
 0x937   : > { %s4797_s3 = sld [smem:[#allocation39_spill]] }
 0x938   : > { %s49_s28 = sadd.s32 1, %s4792_s11  }
 0x939   : > { %p46_p5 = scmp.ge.s32.totalorder %s49_s28, 4  }
 0x93b   :  { %48 = sbr.rel (!%p46_p5) target bundleno = 38 (0x26), region = 290 }
 0x940   :  { %2524 = vsyncpa [#allocation4], 1 }
 0x941   :  { %2526 = vsyncpa [#allocation4 + $0x1], 1 }
 0x942   :  { %2527 = vsyncpa [#allocation7], 1 }
 0x943   :  { %2528 = vsyncpa [#allocation10], 1 }
 0x944   :  { %2530 = vsyncpa [#allocation10 + $0x1], 1 }
 0x945   :  { %2531 = vsyncpa [#allocation13], 1 }
 0x946   :  { %2533 = vsyncpa [#allocation13 + $0x1], 1 }
 0x947   :  { %2534 = vsyncpa [#allocation16], 1 }
 0x948   :  { %2536 = vsyncpa [#allocation16 + $0x1], 1 }
 0x949   :  { %2537 = vsyncpa [#allocation19], 1 }
 0x94a   :  { %2539 = vsyncpa [#allocation19 + $0x1], 1 }
 0x94b   :  { %2540 = vsyncpa [#allocation22], 1 }
 0x94c   :  { %2542 = vsyncpa [#allocation22 + $0x1], 1 }
 0x94d   :  { %2543 = vsyncpa [#allocation5], 1 }
 0x94e   :  { %2545 = vsyncpa [#allocation5 + $0x1], 1 }

</bundles_post_ra>
